<compile_context>
chip_gen: v5e
topology: v5e:2x2
jax: 0.10.0
libtpu: 0.0.40
codegen_flags: <defaults>
</compile_context>

<pallas_src>
import jax
import jax.numpy as jnp
from jax.experimental import pallas as pl
from jax.experimental.pallas import tpu as pltpu

# ----------------------------- config -----------------------------
VOCAB = 100
HIDDEN = 32
N_LAYERS = 2
N_HEADS = 4
HEAD_DIM = HIDDEN // N_HEADS
FFN = 4 * HIDDEN
MAX_POS = 64
PAD_ID = 1            # roberta pad_token_id
LN_EPS = 1e-5
N_CLASSES = 16
BATCH = 2
SEQ = 8
DTYPE = jnp.float32
MASK_NEG = -1e9       # finite large-negative additive mask (safer than finfo.min)


# ----------------------------- pallas kernel -----------------------------
def _full_spec(shape):
    # whole-array block; everything here is tiny and comfortably VMEM-resident
    return pl.BlockSpec(shape, lambda: (0,) * len(shape))


def _layernorm(x, g, b, eps=LN_EPS):
    mu = jnp.mean(x, axis=-1, keepdims=True)
    var = jnp.mean((x - mu) ** 2, axis=-1, keepdims=True)
    return (x - mu) * jax.lax.rsqrt(var + eps) * g + b


def _fused_forward_kernel(emb_ref, mask_ref,
                          emb_g_ref, emb_b_ref,
                          wqkv_ref, bqkv_ref, wo_ref, bo_ref,
                          ln1_g_ref, ln1_b_ref,
                          win_ref, bin_ref, wout_ref, bout_ref,
                          ln2_g_ref, ln2_b_ref,
                          pre_w_ref, pre_b_ref, cls_w_ref, cls_b_ref,
                          out_ref, attn_acc):
    f32 = jnp.float32
    scale = 1.0 / float(HEAD_DIM) ** 0.5
    mask = mask_ref[...]                                           # (B, S) additive

    # --- embeddings LayerNorm ---
    x = _layernorm(emb_ref[...].astype(f32), emb_g_ref[...], emb_b_ref[...])  # (B*S, H)

    # --- encoder layers (statically unrolled) ---
    for l in range(N_LAYERS):
        wqkv = wqkv_ref[l]            # (H, 3H)  (q | k | v columns)
        bqkv = bqkv_ref[l]            # (1, 3H)
        wo = wo_ref[l]                # (H, H)
        bo = bo_ref[l]                # (1, H)

        # fused Q/K/V projection: one MXU matmul with N = 3H
        qkv = jnp.dot(x, wqkv, preferred_element_type=f32) + bqkv  # (B*S, 3H)

        # attention: per (batch, head) 2-D dots; heads merged by accumulating
        # ctx @ Wo_head into the per-batch row block of the VMEM scratch.
        for b in range(BATCH):
            r0 = b * SEQ
            mask_b = mask[b:b + 1, :]                              # (1, S)
            attn_b = jnp.zeros((SEQ, HIDDEN), f32)
            for h in range(N_HEADS):
                c0 = h * HEAD_DIM
                q = qkv[r0:r0 + SEQ, c0:c0 + HEAD_DIM]                              # (S, Dh)
                k = qkv[r0:r0 + SEQ, HIDDEN + c0:HIDDEN + c0 + HEAD_DIM]            # (S, Dh)
                v = qkv[r0:r0 + SEQ, 2 * HIDDEN + c0:2 * HIDDEN + c0 + HEAD_DIM]    # (S, Dh)

                s = jax.lax.dot_general(q, k, (((1,), (1,)), ((), ())),
                                        preferred_element_type=f32) * scale         # (S, S)
                s = s + mask_b
                s = s - jnp.max(s, axis=-1, keepdims=True)
                p = jnp.exp(s)
                p = p * pl.reciprocal(jnp.sum(p, axis=-1, keepdims=True), approx=True)

                ctx = jnp.dot(p, v, preferred_element_type=f32)                     # (S, Dh)
                wo_h = wo[c0:c0 + HEAD_DIM, :]                                      # (Dh, H)
                attn_b = attn_b + jnp.dot(ctx, wo_h, preferred_element_type=f32)    # (S, H)
            attn_acc[r0:r0 + SEQ, :] = attn_b

        # output-proj bias + dropout(eval=identity) + residual + LayerNorm (fused)
        attn_out = attn_acc[...] + bo
        x = _layernorm(attn_out + x, ln1_g_ref[l], ln1_b_ref[l])

        # feed-forward
        inter = jnp.dot(x, win_ref[l], preferred_element_type=f32) + bin_ref[l]     # (B*S, FFN)
        # TODO(synk): HF RoBERTa uses exact (erf) GELU; tanh approximation used here.
        inter = jax.nn.gelu(inter, approximate=True)
        ffn_out = jnp.dot(inter, wout_ref[l], preferred_element_type=f32) + bout_ref[l]
        x = _layernorm(ffn_out + x, ln2_g_ref[l], ln2_b_ref[l])

    # --- classification head (computed for all rows; CLS rows selected outside) ---
    hcls = jnp.dot(x, pre_w_ref[...], preferred_element_type=f32) + pre_b_ref[...]
    hcls = jnp.maximum(hcls, 0.0)                     # pre_classifier + ReLU
    # Dropout(p=0.3) is identity in eval mode.
    logits = jnp.dot(hcls, cls_w_ref[...], preferred_element_type=f32) + cls_b_ref[...]
    out_ref[...] = logits.astype(out_ref.dtype)


# ----------------------------- parameters -----------------------------
def init_params(key):
    def nrm(k, shape, scale=0.02):
        return (scale * jax.random.normal(k, shape)).astype(DTYPE)

    keys = iter(jax.random.split(key, 200))
    p = {
        "word_emb": nrm(next(keys), (VOCAB, HIDDEN)),
        "pos_emb": nrm(next(keys), (MAX_POS, HIDDEN)),
        "type_emb": nrm(next(keys), (1, HIDDEN)),
        "emb_ln_g": jnp.ones((HIDDEN,), DTYPE),
        "emb_ln_b": jnp.zeros((HIDDEN,), DTYPE),
        "layers": [],
        "pre_w": nrm(next(keys), (HIDDEN, HIDDEN)),
        "pre_b": jnp.zeros((HIDDEN,), DTYPE),
        "cls_w": nrm(next(keys), (HIDDEN, N_CLASSES)),
        "cls_b": jnp.zeros((N_CLASSES,), DTYPE),
    }
    for _ in range(N_LAYERS):
        layer = {
            "wq": nrm(next(keys), (HIDDEN, HIDDEN)), "bq": jnp.zeros((HIDDEN,), DTYPE),
            "wk": nrm(next(keys), (HIDDEN, HIDDEN)), "bk": jnp.zeros((HIDDEN,), DTYPE),
            "wv": nrm(next(keys), (HIDDEN, HIDDEN)), "bv": jnp.zeros((HIDDEN,), DTYPE),
            "wo": nrm(next(keys), (HIDDEN, HIDDEN)), "bo": jnp.zeros((HIDDEN,), DTYPE),
            "ln1_g": jnp.ones((HIDDEN,), DTYPE), "ln1_b": jnp.zeros((HIDDEN,), DTYPE),
            "w_in": nrm(next(keys), (HIDDEN, FFN)), "b_in": jnp.zeros((FFN,), DTYPE),
            "w_out": nrm(next(keys), (FFN, HIDDEN)), "b_out": jnp.zeros((HIDDEN,), DTYPE),
            "ln2_g": jnp.ones((HIDDEN,), DTYPE), "ln2_b": jnp.zeros((HIDDEN,), DTYPE),
        }
        p["layers"].append(layer)
    return p


def pack_params(params):
    """Stack per-layer weights along a leading layer axis; merge QKV columns."""
    def stack(fn):
        return jnp.stack([fn(l) for l in params["layers"]])

    return {
        "emb_g": params["emb_ln_g"].reshape(1, HIDDEN),
        "emb_b": params["emb_ln_b"].reshape(1, HIDDEN),
        "wqkv": stack(lambda l: jnp.concatenate([l["wq"], l["wk"], l["wv"]], axis=1)),
        "bqkv": stack(lambda l: jnp.concatenate(
            [l["bq"], l["bk"], l["bv"]]).reshape(1, 3 * HIDDEN)),
        "wo": stack(lambda l: l["wo"]),
        "bo": stack(lambda l: l["bo"].reshape(1, HIDDEN)),
        "ln1_g": stack(lambda l: l["ln1_g"].reshape(1, HIDDEN)),
        "ln1_b": stack(lambda l: l["ln1_b"].reshape(1, HIDDEN)),
        "w_in": stack(lambda l: l["w_in"]),
        "b_in": stack(lambda l: l["b_in"].reshape(1, FFN)),
        "w_out": stack(lambda l: l["w_out"]),
        "b_out": stack(lambda l: l["b_out"].reshape(1, HIDDEN)),
        "ln2_g": stack(lambda l: l["ln2_g"].reshape(1, HIDDEN)),
        "ln2_b": stack(lambda l: l["ln2_b"].reshape(1, HIDDEN)),
        "pre_w": params["pre_w"],
        "pre_b": params["pre_b"].reshape(1, HIDDEN),
        "cls_w": params["cls_w"],
        "cls_b": params["cls_b"].reshape(1, N_CLASSES),
    }


# ----------------------------- forward pass -----------------------------
def mbti_classifier_forward(params, input_ids, attention_mask):
    B, S = input_ids.shape

    # Embedding lookups (data-dependent gathers) + roberta position ids in plain JAX.
    not_pad = (input_ids != PAD_ID).astype(jnp.int32)
    pos_ids = jnp.cumsum(not_pad, axis=1) * not_pad + PAD_ID
    emb = (params["word_emb"][input_ids]
           + params["pos_emb"][pos_ids]
           + params["type_emb"][jnp.zeros_like(input_ids)])
    emb2d = emb.reshape(B * S, HIDDEN).astype(DTYPE)

    # additive attention mask: 0 where attended, -1e9 where masked
    add_mask = (1.0 - attention_mask.astype(DTYPE)) * MASK_NEG      # (B, S)

    p = pack_params(params)
    args = (emb2d, add_mask,
            p["emb_g"], p["emb_b"],
            p["wqkv"], p["bqkv"], p["wo"], p["bo"],
            p["ln1_g"], p["ln1_b"],
            p["w_in"], p["b_in"], p["w_out"], p["b_out"],
            p["ln2_g"], p["ln2_b"],
            p["pre_w"], p["pre_b"], p["cls_w"], p["cls_b"])

    logits_all = pl.pallas_call(
        _fused_forward_kernel,
        out_shape=jax.ShapeDtypeStruct((B * S, N_CLASSES), DTYPE),
        in_specs=[_full_spec(a.shape) for a in args],
        out_specs=_full_spec((B * S, N_CLASSES)),
        scratch_shapes=[pltpu.VMEM((B * S, HIDDEN), jnp.float32)],
    )(*args)

    # pooled CLS token = row 0 of each sequence
    return logits_all.reshape(B, S, N_CLASSES)[:, 0]                # (B, 16)


# ----------------------------- main -----------------------------
if __name__ == "__main__":
    key = jax.random.PRNGKey(0)
    k_param, k_ids = jax.random.split(key)
    params = init_params(k_param)

    input_ids = jax.random.randint(k_ids, (BATCH, SEQ), 2, VOCAB, dtype=jnp.int32)
    input_ids = input_ids.at[:, 0].set(0)            # CLS-like token at position 0
    attention_mask = jnp.ones((BATCH, SEQ), dtype=jnp.int32)

    forward = jax.jit(mbti_classifier_forward)
    logits = forward(params, input_ids, attention_mask)
    logits = jax.block_until_ready(logits)
    assert logits.shape == (BATCH, N_CLASSES)
    print("KERNEL_OK")
</pallas_src>

<mosaic_0001>
module attributes {stable_mosaic.version = 11 : i64} {
  func.func @_fused_forward_kernel(%arg0: memref<16x32xf32, #tpu.memory_space<vmem>>, %arg1: memref<2x8xf32, #tpu.memory_space<vmem>>, %arg2: memref<1x32xf32, #tpu.memory_space<vmem>>, %arg3: memref<1x32xf32, #tpu.memory_space<vmem>>, %arg4: memref<2x32x96xf32, #tpu.memory_space<vmem>>, %arg5: memref<2x1x96xf32, #tpu.memory_space<vmem>>, %arg6: memref<2x32x32xf32, #tpu.memory_space<vmem>>, %arg7: memref<2x1x32xf32, #tpu.memory_space<vmem>>, %arg8: memref<2x1x32xf32, #tpu.memory_space<vmem>>, %arg9: memref<2x1x32xf32, #tpu.memory_space<vmem>>, %arg10: memref<2x32x128xf32, #tpu.memory_space<vmem>>, %arg11: memref<2x1x128xf32, #tpu.memory_space<vmem>>, %arg12: memref<2x128x32xf32, #tpu.memory_space<vmem>>, %arg13: memref<2x1x32xf32, #tpu.memory_space<vmem>>, %arg14: memref<2x1x32xf32, #tpu.memory_space<vmem>>, %arg15: memref<2x1x32xf32, #tpu.memory_space<vmem>>, %arg16: memref<32x32xf32, #tpu.memory_space<vmem>>, %arg17: memref<1x32xf32, #tpu.memory_space<vmem>>, %arg18: memref<32x16xf32, #tpu.memory_space<vmem>>, %arg19: memref<1x16xf32, #tpu.memory_space<vmem>>, %arg20: memref<16x16xf32, #tpu.memory_space<vmem>>, %arg21: memref<16x32xf32, #tpu.memory_space<vmem>>) attributes {dimension_semantics = [], scalar_prefetch = 0 : i64, scratch_operands = 1 : i64, tpu.core_type = #tpu.core_type<tc>} {
    %c0 = arith.constant 0 : index
    %c0_0 = arith.constant 0 : index
    %0 = vector.load %arg1[%c0, %c0_0] : memref<2x8xf32, #tpu.memory_space<vmem>>, vector<2x8xf32>
    %c0_1 = arith.constant 0 : index
    %c0_2 = arith.constant 0 : index
    %1 = vector.load %arg0[%c0_1, %c0_2] : memref<16x32xf32, #tpu.memory_space<vmem>>, vector<16x32xf32>
    %c0_3 = arith.constant 0 : index
    %c0_4 = arith.constant 0 : index
    %2 = vector.load %arg2[%c0_3, %c0_4] : memref<1x32xf32, #tpu.memory_space<vmem>>, vector<1x32xf32>
    %c0_5 = arith.constant 0 : index
    %c0_6 = arith.constant 0 : index
    %3 = vector.load %arg3[%c0_5, %c0_6] : memref<1x32xf32, #tpu.memory_space<vmem>>, vector<1x32xf32>
    %cst = arith.constant dense<0.000000e+00> : vector<16xf32>
    %4 = vector.multi_reduction <add>, %1, %cst [1] : vector<16x32xf32> to vector<16xf32>
    %5 = vector.shape_cast %4 : vector<16xf32> to vector<16x1xf32>
    %cst_7 = arith.constant 3.200000e+01 : f32
    %6 = vector.broadcast %cst_7 : f32 to vector<16x1xf32>
    %7 = arith.divf %5, %6 : vector<16x1xf32>
    %8 = vector.broadcast %7 : vector<16x1xf32> to vector<16x32xf32>
    %9 = arith.subf %1, %8 : vector<16x32xf32>
    %10 = arith.mulf %9, %9 : vector<16x32xf32>
    %cst_8 = arith.constant dense<0.000000e+00> : vector<16xf32>
    %11 = vector.multi_reduction <add>, %10, %cst_8 [1] : vector<16x32xf32> to vector<16xf32>
    %12 = vector.shape_cast %11 : vector<16xf32> to vector<16x1xf32>
    %cst_9 = arith.constant 3.200000e+01 : f32
    %13 = vector.broadcast %cst_9 : f32 to vector<16x1xf32>
    %14 = arith.divf %12, %13 : vector<16x1xf32>
    %15 = vector.broadcast %7 : vector<16x1xf32> to vector<16x32xf32>
    %16 = arith.subf %1, %15 : vector<16x32xf32>
    %cst_10 = arith.constant 9.99999974E-6 : f32
    %17 = vector.broadcast %cst_10 : f32 to vector<16x1xf32>
    %18 = arith.addf %14, %17 : vector<16x1xf32>
    %19 = math.rsqrt %18 : vector<16x1xf32>
    %20 = vector.broadcast %19 : vector<16x1xf32> to vector<16x32xf32>
    %21 = arith.mulf %16, %20 : vector<16x32xf32>
    %22 = vector.broadcast %2 : vector<1x32xf32> to vector<16x32xf32>
    %23 = arith.mulf %21, %22 : vector<16x32xf32>
    %24 = vector.broadcast %3 : vector<1x32xf32> to vector<16x32xf32>
    %25 = arith.addf %23, %24 : vector<16x32xf32>
    %c0_11 = arith.constant 0 : index
    %c0_12 = arith.constant 0 : index
    %c0_13 = arith.constant 0 : index
    %26 = vector.load %arg4[%c0_11, %c0_12, %c0_13] : memref<2x32x96xf32, #tpu.memory_space<vmem>>, vector<1x32x96xf32>
    %27 = vector.shape_cast %26 : vector<1x32x96xf32> to vector<32x96xf32>
    %c0_14 = arith.constant 0 : index
    %c0_15 = arith.constant 0 : index
    %c0_16 = arith.constant 0 : index
    %28 = vector.load %arg5[%c0_14, %c0_15, %c0_16] : memref<2x1x96xf32, #tpu.memory_space<vmem>>, vector<1x1x96xf32>
    %29 = vector.shape_cast %28 : vector<1x1x96xf32> to vector<1x96xf32>
    %c0_17 = arith.constant 0 : index
    %c0_18 = arith.constant 0 : index
    %c0_19 = arith.constant 0 : index
    %30 = vector.load %arg6[%c0_17, %c0_18, %c0_19] : memref<2x32x32xf32, #tpu.memory_space<vmem>>, vector<1x32x32xf32>
    %31 = vector.shape_cast %30 : vector<1x32x32xf32> to vector<32x32xf32>
    %c0_20 = arith.constant 0 : index
    %c0_21 = arith.constant 0 : index
    %c0_22 = arith.constant 0 : index
    %32 = vector.load %arg7[%c0_20, %c0_21, %c0_22] : memref<2x1x32xf32, #tpu.memory_space<vmem>>, vector<1x1x32xf32>
    %33 = vector.shape_cast %32 : vector<1x1x32xf32> to vector<1x32xf32>
    %cst_23 = arith.constant dense<0.000000e+00> : vector<16x96xf32>
    %34 = tpu.matmul %25, %27, %cst_23 {dimension_numbers = #tpu.dot_dimension_numbers<[1], [0], [0], [1], [0, 0, 1, 1], [], []>} : vector<16x32xf32>, vector<32x96xf32>, vector<16x96xf32> -> vector<16x96xf32>
    %35 = vector.broadcast %29 : vector<1x96xf32> to vector<16x96xf32>
    %36 = arith.addf %34, %35 : vector<16x96xf32>
    %37 = vector.extract_strided_slice %0 {offsets = [0, 0], sizes = [1, 8], strides = [1, 1]} : vector<2x8xf32> to vector<1x8xf32>
    %cst_24 = arith.constant 0.000000e+00 : f32
    %38 = vector.broadcast %cst_24 : f32 to vector<8x32xf32>
    %39 = vector.extract_strided_slice %36 {offsets = [0, 0], sizes = [8, 8], strides = [1, 1]} : vector<16x96xf32> to vector<8x8xf32>
    %40 = vector.extract_strided_slice %36 {offsets = [0, 32], sizes = [8, 8], strides = [1, 1]} : vector<16x96xf32> to vector<8x8xf32>
    %41 = vector.extract_strided_slice %36 {offsets = [0, 64], sizes = [8, 8], strides = [1, 1]} : vector<16x96xf32> to vector<8x8xf32>
    %cst_25 = arith.constant dense<0.000000e+00> : vector<8x8xf32>
    %42 = tpu.matmul %39, %40, %cst_25 {dimension_numbers = #tpu.dot_dimension_numbers<[1], [1], [0], [0], [0, 0, 1, 0], [], []>} : vector<8x8xf32>, vector<8x8xf32>, vector<8x8xf32> -> vector<8x8xf32>
    %cst_26 = arith.constant 0.353553385 : f32
    %43 = vector.broadcast %cst_26 : f32 to vector<8x8xf32>
    %44 = arith.mulf %42, %43 : vector<8x8xf32>
    %45 = vector.broadcast %37 : vector<1x8xf32> to vector<8x8xf32>
    %46 = arith.addf %44, %45 : vector<8x8xf32>
    %cst_27 = arith.constant dense<0xFF800000> : vector<8xf32>
    %47 = vector.multi_reduction <maximumf>, %46, %cst_27 [1] : vector<8x8xf32> to vector<8xf32>
    %48 = vector.shape_cast %47 : vector<8xf32> to vector<8x1xf32>
    %49 = vector.broadcast %48 : vector<8x1xf32> to vector<8x8xf32>
    %50 = arith.subf %46, %49 : vector<8x8xf32>
    %51 = math.exp %50 : vector<8x8xf32>
    %cst_28 = arith.constant dense<0.000000e+00> : vector<8xf32>
    %52 = vector.multi_reduction <add>, %51, %cst_28 [1] : vector<8x8xf32> to vector<8xf32>
    %53 = vector.shape_cast %52 : vector<8xf32> to vector<8x1xf32>
    %54 = tpu.reciprocal %53 {approx = true} : vector<8x1xf32> -> vector<8x1xf32>
    %55 = vector.broadcast %54 : vector<8x1xf32> to vector<8x8xf32>
    %56 = arith.mulf %51, %55 : vector<8x8xf32>
    %cst_29 = arith.constant dense<0.000000e+00> : vector<8x8xf32>
    %57 = tpu.matmul %56, %41, %cst_29 {dimension_numbers = #tpu.dot_dimension_numbers<[1], [0], [0], [1], [0, 0, 1, 1], [], []>} : vector<8x8xf32>, vector<8x8xf32>, vector<8x8xf32> -> vector<8x8xf32>
    %58 = vector.extract_strided_slice %31 {offsets = [0, 0], sizes = [8, 32], strides = [1, 1]} : vector<32x32xf32> to vector<8x32xf32>
    %cst_30 = arith.constant dense<0.000000e+00> : vector<8x32xf32>
    %59 = tpu.matmul %57, %58, %cst_30 {dimension_numbers = #tpu.dot_dimension_numbers<[1], [0], [0], [1], [0, 0, 1, 1], [], []>} : vector<8x8xf32>, vector<8x32xf32>, vector<8x32xf32> -> vector<8x32xf32>
    %60 = arith.addf %38, %59 : vector<8x32xf32>
    %61 = vector.extract_strided_slice %36 {offsets = [0, 8], sizes = [8, 8], strides = [1, 1]} : vector<16x96xf32> to vector<8x8xf32>
    %62 = vector.extract_strided_slice %36 {offsets = [0, 40], sizes = [8, 8], strides = [1, 1]} : vector<16x96xf32> to vector<8x8xf32>
    %63 = vector.extract_strided_slice %36 {offsets = [0, 72], sizes = [8, 8], strides = [1, 1]} : vector<16x96xf32> to vector<8x8xf32>
    %cst_31 = arith.constant dense<0.000000e+00> : vector<8x8xf32>
    %64 = tpu.matmul %61, %62, %cst_31 {dimension_numbers = #tpu.dot_dimension_numbers<[1], [1], [0], [0], [0, 0, 1, 0], [], []>} : vector<8x8xf32>, vector<8x8xf32>, vector<8x8xf32> -> vector<8x8xf32>
    %cst_32 = arith.constant 0.353553385 : f32
    %65 = vector.broadcast %cst_32 : f32 to vector<8x8xf32>
    %66 = arith.mulf %64, %65 : vector<8x8xf32>
    %67 = vector.broadcast %37 : vector<1x8xf32> to vector<8x8xf32>
    %68 = arith.addf %66, %67 : vector<8x8xf32>
    %cst_33 = arith.constant dense<0xFF800000> : vector<8xf32>
    %69 = vector.multi_reduction <maximumf>, %68, %cst_33 [1] : vector<8x8xf32> to vector<8xf32>
    %70 = vector.shape_cast %69 : vector<8xf32> to vector<8x1xf32>
    %71 = vector.broadcast %70 : vector<8x1xf32> to vector<8x8xf32>
    %72 = arith.subf %68, %71 : vector<8x8xf32>
    %73 = math.exp %72 : vector<8x8xf32>
    %cst_34 = arith.constant dense<0.000000e+00> : vector<8xf32>
    %74 = vector.multi_reduction <add>, %73, %cst_34 [1] : vector<8x8xf32> to vector<8xf32>
    %75 = vector.shape_cast %74 : vector<8xf32> to vector<8x1xf32>
    %76 = tpu.reciprocal %75 {approx = true} : vector<8x1xf32> -> vector<8x1xf32>
    %77 = vector.broadcast %76 : vector<8x1xf32> to vector<8x8xf32>
    %78 = arith.mulf %73, %77 : vector<8x8xf32>
    %cst_35 = arith.constant dense<0.000000e+00> : vector<8x8xf32>
    %79 = tpu.matmul %78, %63, %cst_35 {dimension_numbers = #tpu.dot_dimension_numbers<[1], [0], [0], [1], [0, 0, 1, 1], [], []>} : vector<8x8xf32>, vector<8x8xf32>, vector<8x8xf32> -> vector<8x8xf32>
    %80 = vector.extract_strided_slice %31 {offsets = [8, 0], sizes = [8, 32], strides = [1, 1]} : vector<32x32xf32> to vector<8x32xf32>
    %cst_36 = arith.constant dense<0.000000e+00> : vector<8x32xf32>
    %81 = tpu.matmul %79, %80, %cst_36 {dimension_numbers = #tpu.dot_dimension_numbers<[1], [0], [0], [1], [0, 0, 1, 1], [], []>} : vector<8x8xf32>, vector<8x32xf32>, vector<8x32xf32> -> vector<8x32xf32>
    %82 = arith.addf %60, %81 : vector<8x32xf32>
    %83 = vector.extract_strided_slice %36 {offsets = [0, 16], sizes = [8, 8], strides = [1, 1]} : vector<16x96xf32> to vector<8x8xf32>
    %84 = vector.extract_strided_slice %36 {offsets = [0, 48], sizes = [8, 8], strides = [1, 1]} : vector<16x96xf32> to vector<8x8xf32>
    %85 = vector.extract_strided_slice %36 {offsets = [0, 80], sizes = [8, 8], strides = [1, 1]} : vector<16x96xf32> to vector<8x8xf32>
    %cst_37 = arith.constant dense<0.000000e+00> : vector<8x8xf32>
    %86 = tpu.matmul %83, %84, %cst_37 {dimension_numbers = #tpu.dot_dimension_numbers<[1], [1], [0], [0], [0, 0, 1, 0], [], []>} : vector<8x8xf32>, vector<8x8xf32>, vector<8x8xf32> -> vector<8x8xf32>
    %cst_38 = arith.constant 0.353553385 : f32
    %87 = vector.broadcast %cst_38 : f32 to vector<8x8xf32>
    %88 = arith.mulf %86, %87 : vector<8x8xf32>
    %89 = vector.broadcast %37 : vector<1x8xf32> to vector<8x8xf32>
    %90 = arith.addf %88, %89 : vector<8x8xf32>
    %cst_39 = arith.constant dense<0xFF800000> : vector<8xf32>
    %91 = vector.multi_reduction <maximumf>, %90, %cst_39 [1] : vector<8x8xf32> to vector<8xf32>
    %92 = vector.shape_cast %91 : vector<8xf32> to vector<8x1xf32>
    %93 = vector.broadcast %92 : vector<8x1xf32> to vector<8x8xf32>
    %94 = arith.subf %90, %93 : vector<8x8xf32>
    %95 = math.exp %94 : vector<8x8xf32>
    %cst_40 = arith.constant dense<0.000000e+00> : vector<8xf32>
    %96 = vector.multi_reduction <add>, %95, %cst_40 [1] : vector<8x8xf32> to vector<8xf32>
    %97 = vector.shape_cast %96 : vector<8xf32> to vector<8x1xf32>
    %98 = tpu.reciprocal %97 {approx = true} : vector<8x1xf32> -> vector<8x1xf32>
    %99 = vector.broadcast %98 : vector<8x1xf32> to vector<8x8xf32>
    %100 = arith.mulf %95, %99 : vector<8x8xf32>
    %cst_41 = arith.constant dense<0.000000e+00> : vector<8x8xf32>
    %101 = tpu.matmul %100, %85, %cst_41 {dimension_numbers = #tpu.dot_dimension_numbers<[1], [0], [0], [1], [0, 0, 1, 1], [], []>} : vector<8x8xf32>, vector<8x8xf32>, vector<8x8xf32> -> vector<8x8xf32>
    %102 = vector.extract_strided_slice %31 {offsets = [16, 0], sizes = [8, 32], strides = [1, 1]} : vector<32x32xf32> to vector<8x32xf32>
    %cst_42 = arith.constant dense<0.000000e+00> : vector<8x32xf32>
    %103 = tpu.matmul %101, %102, %cst_42 {dimension_numbers = #tpu.dot_dimension_numbers<[1], [0], [0], [1], [0, 0, 1, 1], [], []>} : vector<8x8xf32>, vector<8x32xf32>, vector<8x32xf32> -> vector<8x32xf32>
    %104 = arith.addf %82, %103 : vector<8x32xf32>
    %105 = vector.extract_strided_slice %36 {offsets = [0, 24], sizes = [8, 8], strides = [1, 1]} : vector<16x96xf32> to vector<8x8xf32>
    %106 = vector.extract_strided_slice %36 {offsets = [0, 56], sizes = [8, 8], strides = [1, 1]} : vector<16x96xf32> to vector<8x8xf32>
    %107 = vector.extract_strided_slice %36 {offsets = [0, 88], sizes = [8, 8], strides = [1, 1]} : vector<16x96xf32> to vector<8x8xf32>
    %cst_43 = arith.constant dense<0.000000e+00> : vector<8x8xf32>
    %108 = tpu.matmul %105, %106, %cst_43 {dimension_numbers = #tpu.dot_dimension_numbers<[1], [1], [0], [0], [0, 0, 1, 0], [], []>} : vector<8x8xf32>, vector<8x8xf32>, vector<8x8xf32> -> vector<8x8xf32>
    %cst_44 = arith.constant 0.353553385 : f32
    %109 = vector.broadcast %cst_44 : f32 to vector<8x8xf32>
    %110 = arith.mulf %108, %109 : vector<8x8xf32>
    %111 = vector.broadcast %37 : vector<1x8xf32> to vector<8x8xf32>
    %112 = arith.addf %110, %111 : vector<8x8xf32>
    %cst_45 = arith.constant dense<0xFF800000> : vector<8xf32>
    %113 = vector.multi_reduction <maximumf>, %112, %cst_45 [1] : vector<8x8xf32> to vector<8xf32>
    %114 = vector.shape_cast %113 : vector<8xf32> to vector<8x1xf32>
    %115 = vector.broadcast %114 : vector<8x1xf32> to vector<8x8xf32>
    %116 = arith.subf %112, %115 : vector<8x8xf32>
    %117 = math.exp %116 : vector<8x8xf32>
    %cst_46 = arith.constant dense<0.000000e+00> : vector<8xf32>
    %118 = vector.multi_reduction <add>, %117, %cst_46 [1] : vector<8x8xf32> to vector<8xf32>
    %119 = vector.shape_cast %118 : vector<8xf32> to vector<8x1xf32>
    %120 = tpu.reciprocal %119 {approx = true} : vector<8x1xf32> -> vector<8x1xf32>
    %121 = vector.broadcast %120 : vector<8x1xf32> to vector<8x8xf32>
    %122 = arith.mulf %117, %121 : vector<8x8xf32>
    %cst_47 = arith.constant dense<0.000000e+00> : vector<8x8xf32>
    %123 = tpu.matmul %122, %107, %cst_47 {dimension_numbers = #tpu.dot_dimension_numbers<[1], [0], [0], [1], [0, 0, 1, 1], [], []>} : vector<8x8xf32>, vector<8x8xf32>, vector<8x8xf32> -> vector<8x8xf32>
    %124 = vector.extract_strided_slice %31 {offsets = [24, 0], sizes = [8, 32], strides = [1, 1]} : vector<32x32xf32> to vector<8x32xf32>
    %cst_48 = arith.constant dense<0.000000e+00> : vector<8x32xf32>
    %125 = tpu.matmul %123, %124, %cst_48 {dimension_numbers = #tpu.dot_dimension_numbers<[1], [0], [0], [1], [0, 0, 1, 1], [], []>} : vector<8x8xf32>, vector<8x32xf32>, vector<8x32xf32> -> vector<8x32xf32>
    %126 = arith.addf %104, %125 : vector<8x32xf32>
    %c0_49 = arith.constant 0 : index
    %c0_50 = arith.constant 0 : index
    %127 = vector.load %arg21[%c0_49, %c0_50] : memref<16x32xf32, #tpu.memory_space<vmem>>, vector<8x32xf32>
    tpu.vector_store %arg21[%c0_49, %c0_50], %126 {strides = array<i32>} : memref<16x32xf32, #tpu.memory_space<vmem>>, vector<8x32xf32>,
    %128 = vector.extract_strided_slice %0 {offsets = [1, 0], sizes = [1, 8], strides = [1, 1]} : vector<2x8xf32> to vector<1x8xf32>
    %cst_51 = arith.constant 0.000000e+00 : f32
    %129 = vector.broadcast %cst_51 : f32 to vector<8x32xf32>
    %130 = vector.extract_strided_slice %36 {offsets = [8, 0], sizes = [8, 8], strides = [1, 1]} : vector<16x96xf32> to vector<8x8xf32>
    %131 = vector.extract_strided_slice %36 {offsets = [8, 32], sizes = [8, 8], strides = [1, 1]} : vector<16x96xf32> to vector<8x8xf32>
    %132 = vector.extract_strided_slice %36 {offsets = [8, 64], sizes = [8, 8], strides = [1, 1]} : vector<16x96xf32> to vector<8x8xf32>
    %cst_52 = arith.constant dense<0.000000e+00> : vector<8x8xf32>
    %133 = tpu.matmul %130, %131, %cst_52 {dimension_numbers = #tpu.dot_dimension_numbers<[1], [1], [0], [0], [0, 0, 1, 0], [], []>} : vector<8x8xf32>, vector<8x8xf32>, vector<8x8xf32> -> vector<8x8xf32>
    %cst_53 = arith.constant 0.353553385 : f32
    %134 = vector.broadcast %cst_53 : f32 to vector<8x8xf32>
    %135 = arith.mulf %133, %134 : vector<8x8xf32>
    %136 = vector.broadcast %128 : vector<1x8xf32> to vector<8x8xf32>
    %137 = arith.addf %135, %136 : vector<8x8xf32>
    %cst_54 = arith.constant dense<0xFF800000> : vector<8xf32>
    %138 = vector.multi_reduction <maximumf>, %137, %cst_54 [1] : vector<8x8xf32> to vector<8xf32>
    %139 = vector.shape_cast %138 : vector<8xf32> to vector<8x1xf32>
    %140 = vector.broadcast %139 : vector<8x1xf32> to vector<8x8xf32>
    %141 = arith.subf %137, %140 : vector<8x8xf32>
    %142 = math.exp %141 : vector<8x8xf32>
    %cst_55 = arith.constant dense<0.000000e+00> : vector<8xf32>
    %143 = vector.multi_reduction <add>, %142, %cst_55 [1] : vector<8x8xf32> to vector<8xf32>
    %144 = vector.shape_cast %143 : vector<8xf32> to vector<8x1xf32>
    %145 = tpu.reciprocal %144 {approx = true} : vector<8x1xf32> -> vector<8x1xf32>
    %146 = vector.broadcast %145 : vector<8x1xf32> to vector<8x8xf32>
    %147 = arith.mulf %142, %146 : vector<8x8xf32>
    %cst_56 = arith.constant dense<0.000000e+00> : vector<8x8xf32>
    %148 = tpu.matmul %147, %132, %cst_56 {dimension_numbers = #tpu.dot_dimension_numbers<[1], [0], [0], [1], [0, 0, 1, 1], [], []>} : vector<8x8xf32>, vector<8x8xf32>, vector<8x8xf32> -> vector<8x8xf32>
    %149 = vector.extract_strided_slice %31 {offsets = [0, 0], sizes = [8, 32], strides = [1, 1]} : vector<32x32xf32> to vector<8x32xf32>
    %cst_57 = arith.constant dense<0.000000e+00> : vector<8x32xf32>
    %150 = tpu.matmul %148, %149, %cst_57 {dimension_numbers = #tpu.dot_dimension_numbers<[1], [0], [0], [1], [0, 0, 1, 1], [], []>} : vector<8x8xf32>, vector<8x32xf32>, vector<8x32xf32> -> vector<8x32xf32>
    %151 = arith.addf %129, %150 : vector<8x32xf32>
    %152 = vector.extract_strided_slice %36 {offsets = [8, 8], sizes = [8, 8], strides = [1, 1]} : vector<16x96xf32> to vector<8x8xf32>
    %153 = vector.extract_strided_slice %36 {offsets = [8, 40], sizes = [8, 8], strides = [1, 1]} : vector<16x96xf32> to vector<8x8xf32>
    %154 = vector.extract_strided_slice %36 {offsets = [8, 72], sizes = [8, 8], strides = [1, 1]} : vector<16x96xf32> to vector<8x8xf32>
    %cst_58 = arith.constant dense<0.000000e+00> : vector<8x8xf32>
    %155 = tpu.matmul %152, %153, %cst_58 {dimension_numbers = #tpu.dot_dimension_numbers<[1], [1], [0], [0], [0, 0, 1, 0], [], []>} : vector<8x8xf32>, vector<8x8xf32>, vector<8x8xf32> -> vector<8x8xf32>
    %cst_59 = arith.constant 0.353553385 : f32
    %156 = vector.broadcast %cst_59 : f32 to vector<8x8xf32>
    %157 = arith.mulf %155, %156 : vector<8x8xf32>
    %158 = vector.broadcast %128 : vector<1x8xf32> to vector<8x8xf32>
    %159 = arith.addf %157, %158 : vector<8x8xf32>
    %cst_60 = arith.constant dense<0xFF800000> : vector<8xf32>
    %160 = vector.multi_reduction <maximumf>, %159, %cst_60 [1] : vector<8x8xf32> to vector<8xf32>
    %161 = vector.shape_cast %160 : vector<8xf32> to vector<8x1xf32>
    %162 = vector.broadcast %161 : vector<8x1xf32> to vector<8x8xf32>
    %163 = arith.subf %159, %162 : vector<8x8xf32>
    %164 = math.exp %163 : vector<8x8xf32>
    %cst_61 = arith.constant dense<0.000000e+00> : vector<8xf32>
    %165 = vector.multi_reduction <add>, %164, %cst_61 [1] : vector<8x8xf32> to vector<8xf32>
    %166 = vector.shape_cast %165 : vector<8xf32> to vector<8x1xf32>
    %167 = tpu.reciprocal %166 {approx = true} : vector<8x1xf32> -> vector<8x1xf32>
    %168 = vector.broadcast %167 : vector<8x1xf32> to vector<8x8xf32>
    %169 = arith.mulf %164, %168 : vector<8x8xf32>
    %cst_62 = arith.constant dense<0.000000e+00> : vector<8x8xf32>
    %170 = tpu.matmul %169, %154, %cst_62 {dimension_numbers = #tpu.dot_dimension_numbers<[1], [0], [0], [1], [0, 0, 1, 1], [], []>} : vector<8x8xf32>, vector<8x8xf32>, vector<8x8xf32> -> vector<8x8xf32>
    %171 = vector.extract_strided_slice %31 {offsets = [8, 0], sizes = [8, 32], strides = [1, 1]} : vector<32x32xf32> to vector<8x32xf32>
    %cst_63 = arith.constant dense<0.000000e+00> : vector<8x32xf32>
    %172 = tpu.matmul %170, %171, %cst_63 {dimension_numbers = #tpu.dot_dimension_numbers<[1], [0], [0], [1], [0, 0, 1, 1], [], []>} : vector<8x8xf32>, vector<8x32xf32>, vector<8x32xf32> -> vector<8x32xf32>
    %173 = arith.addf %151, %172 : vector<8x32xf32>
    %174 = vector.extract_strided_slice %36 {offsets = [8, 16], sizes = [8, 8], strides = [1, 1]} : vector<16x96xf32> to vector<8x8xf32>
    %175 = vector.extract_strided_slice %36 {offsets = [8, 48], sizes = [8, 8], strides = [1, 1]} : vector<16x96xf32> to vector<8x8xf32>
    %176 = vector.extract_strided_slice %36 {offsets = [8, 80], sizes = [8, 8], strides = [1, 1]} : vector<16x96xf32> to vector<8x8xf32>
    %cst_64 = arith.constant dense<0.000000e+00> : vector<8x8xf32>
    %177 = tpu.matmul %174, %175, %cst_64 {dimension_numbers = #tpu.dot_dimension_numbers<[1], [1], [0], [0], [0, 0, 1, 0], [], []>} : vector<8x8xf32>, vector<8x8xf32>, vector<8x8xf32> -> vector<8x8xf32>
    %cst_65 = arith.constant 0.353553385 : f32
    %178 = vector.broadcast %cst_65 : f32 to vector<8x8xf32>
    %179 = arith.mulf %177, %178 : vector<8x8xf32>
    %180 = vector.broadcast %128 : vector<1x8xf32> to vector<8x8xf32>
    %181 = arith.addf %179, %180 : vector<8x8xf32>
    %cst_66 = arith.constant dense<0xFF800000> : vector<8xf32>
    %182 = vector.multi_reduction <maximumf>, %181, %cst_66 [1] : vector<8x8xf32> to vector<8xf32>
    %183 = vector.shape_cast %182 : vector<8xf32> to vector<8x1xf32>
    %184 = vector.broadcast %183 : vector<8x1xf32> to vector<8x8xf32>
    %185 = arith.subf %181, %184 : vector<8x8xf32>
    %186 = math.exp %185 : vector<8x8xf32>
    %cst_67 = arith.constant dense<0.000000e+00> : vector<8xf32>
    %187 = vector.multi_reduction <add>, %186, %cst_67 [1] : vector<8x8xf32> to vector<8xf32>
    %188 = vector.shape_cast %187 : vector<8xf32> to vector<8x1xf32>
    %189 = tpu.reciprocal %188 {approx = true} : vector<8x1xf32> -> vector<8x1xf32>
    %190 = vector.broadcast %189 : vector<8x1xf32> to vector<8x8xf32>
    %191 = arith.mulf %186, %190 : vector<8x8xf32>
    %cst_68 = arith.constant dense<0.000000e+00> : vector<8x8xf32>
    %192 = tpu.matmul %191, %176, %cst_68 {dimension_numbers = #tpu.dot_dimension_numbers<[1], [0], [0], [1], [0, 0, 1, 1], [], []>} : vector<8x8xf32>, vector<8x8xf32>, vector<8x8xf32> -> vector<8x8xf32>
    %193 = vector.extract_strided_slice %31 {offsets = [16, 0], sizes = [8, 32], strides = [1, 1]} : vector<32x32xf32> to vector<8x32xf32>
    %cst_69 = arith.constant dense<0.000000e+00> : vector<8x32xf32>
    %194 = tpu.matmul %192, %193, %cst_69 {dimension_numbers = #tpu.dot_dimension_numbers<[1], [0], [0], [1], [0, 0, 1, 1], [], []>} : vector<8x8xf32>, vector<8x32xf32>, vector<8x32xf32> -> vector<8x32xf32>
    %195 = arith.addf %173, %194 : vector<8x32xf32>
    %196 = vector.extract_strided_slice %36 {offsets = [8, 24], sizes = [8, 8], strides = [1, 1]} : vector<16x96xf32> to vector<8x8xf32>
    %197 = vector.extract_strided_slice %36 {offsets = [8, 56], sizes = [8, 8], strides = [1, 1]} : vector<16x96xf32> to vector<8x8xf32>
    %198 = vector.extract_strided_slice %36 {offsets = [8, 88], sizes = [8, 8], strides = [1, 1]} : vector<16x96xf32> to vector<8x8xf32>
    %cst_70 = arith.constant dense<0.000000e+00> : vector<8x8xf32>
    %199 = tpu.matmul %196, %197, %cst_70 {dimension_numbers = #tpu.dot_dimension_numbers<[1], [1], [0], [0], [0, 0, 1, 0], [], []>} : vector<8x8xf32>, vector<8x8xf32>, vector<8x8xf32> -> vector<8x8xf32>
    %cst_71 = arith.constant 0.353553385 : f32
    %200 = vector.broadcast %cst_71 : f32 to vector<8x8xf32>
    %201 = arith.mulf %199, %200 : vector<8x8xf32>
    %202 = vector.broadcast %128 : vector<1x8xf32> to vector<8x8xf32>
    %203 = arith.addf %201, %202 : vector<8x8xf32>
    %cst_72 = arith.constant dense<0xFF800000> : vector<8xf32>
    %204 = vector.multi_reduction <maximumf>, %203, %cst_72 [1] : vector<8x8xf32> to vector<8xf32>
    %205 = vector.shape_cast %204 : vector<8xf32> to vector<8x1xf32>
    %206 = vector.broadcast %205 : vector<8x1xf32> to vector<8x8xf32>
    %207 = arith.subf %203, %206 : vector<8x8xf32>
    %208 = math.exp %207 : vector<8x8xf32>
    %cst_73 = arith.constant dense<0.000000e+00> : vector<8xf32>
    %209 = vector.multi_reduction <add>, %208, %cst_73 [1] : vector<8x8xf32> to vector<8xf32>
    %210 = vector.shape_cast %209 : vector<8xf32> to vector<8x1xf32>
    %211 = tpu.reciprocal %210 {approx = true} : vector<8x1xf32> -> vector<8x1xf32>
    %212 = vector.broadcast %211 : vector<8x1xf32> to vector<8x8xf32>
    %213 = arith.mulf %208, %212 : vector<8x8xf32>
    %cst_74 = arith.constant dense<0.000000e+00> : vector<8x8xf32>
    %214 = tpu.matmul %213, %198, %cst_74 {dimension_numbers = #tpu.dot_dimension_numbers<[1], [0], [0], [1], [0, 0, 1, 1], [], []>} : vector<8x8xf32>, vector<8x8xf32>, vector<8x8xf32> -> vector<8x8xf32>
    %215 = vector.extract_strided_slice %31 {offsets = [24, 0], sizes = [8, 32], strides = [1, 1]} : vector<32x32xf32> to vector<8x32xf32>
    %cst_75 = arith.constant dense<0.000000e+00> : vector<8x32xf32>
    %216 = tpu.matmul %214, %215, %cst_75 {dimension_numbers = #tpu.dot_dimension_numbers<[1], [0], [0], [1], [0, 0, 1, 1], [], []>} : vector<8x8xf32>, vector<8x32xf32>, vector<8x32xf32> -> vector<8x32xf32>
    %217 = arith.addf %195, %216 : vector<8x32xf32>
    %c8 = arith.constant 8 : index
    %c0_76 = arith.constant 0 : index
    %218 = vector.load %arg21[%c8, %c0_76] : memref<16x32xf32, #tpu.memory_space<vmem>>, vector<8x32xf32>
    tpu.vector_store %arg21[%c8, %c0_76], %217 {strides = array<i32>} : memref<16x32xf32, #tpu.memory_space<vmem>>, vector<8x32xf32>,
    %c0_77 = arith.constant 0 : index
    %c0_78 = arith.constant 0 : index
    %219 = vector.load %arg21[%c0_77, %c0_78] : memref<16x32xf32, #tpu.memory_space<vmem>>, vector<16x32xf32>
    %220 = vector.broadcast %33 : vector<1x32xf32> to vector<16x32xf32>
    %221 = arith.addf %219, %220 : vector<16x32xf32>
    %222 = arith.addf %221, %25 : vector<16x32xf32>
    %c0_79 = arith.constant 0 : index
    %c0_80 = arith.constant 0 : index
    %c0_81 = arith.constant 0 : index
    %223 = vector.load %arg8[%c0_79, %c0_80, %c0_81] : memref<2x1x32xf32, #tpu.memory_space<vmem>>, vector<1x1x32xf32>
    %224 = vector.shape_cast %223 : vector<1x1x32xf32> to vector<1x32xf32>
    %c0_82 = arith.constant 0 : index
    %c0_83 = arith.constant 0 : index
    %c0_84 = arith.constant 0 : index
    %225 = vector.load %arg9[%c0_82, %c0_83, %c0_84] : memref<2x1x32xf32, #tpu.memory_space<vmem>>, vector<1x1x32xf32>
    %226 = vector.shape_cast %225 : vector<1x1x32xf32> to vector<1x32xf32>
    %cst_85 = arith.constant dense<0.000000e+00> : vector<16xf32>
    %227 = vector.multi_reduction <add>, %222, %cst_85 [1] : vector<16x32xf32> to vector<16xf32>
    %228 = vector.shape_cast %227 : vector<16xf32> to vector<16x1xf32>
    %cst_86 = arith.constant 3.200000e+01 : f32
    %229 = vector.broadcast %cst_86 : f32 to vector<16x1xf32>
    %230 = arith.divf %228, %229 : vector<16x1xf32>
    %231 = vector.broadcast %230 : vector<16x1xf32> to vector<16x32xf32>
    %232 = arith.subf %222, %231 : vector<16x32xf32>
    %233 = arith.mulf %232, %232 : vector<16x32xf32>
    %cst_87 = arith.constant dense<0.000000e+00> : vector<16xf32>
    %234 = vector.multi_reduction <add>, %233, %cst_87 [1] : vector<16x32xf32> to vector<16xf32>
    %235 = vector.shape_cast %234 : vector<16xf32> to vector<16x1xf32>
    %cst_88 = arith.constant 3.200000e+01 : f32
    %236 = vector.broadcast %cst_88 : f32 to vector<16x1xf32>
    %237 = arith.divf %235, %236 : vector<16x1xf32>
    %238 = vector.broadcast %230 : vector<16x1xf32> to vector<16x32xf32>
    %239 = arith.subf %222, %238 : vector<16x32xf32>
    %cst_89 = arith.constant 9.99999974E-6 : f32
    %240 = vector.broadcast %cst_89 : f32 to vector<16x1xf32>
    %241 = arith.addf %237, %240 : vector<16x1xf32>
    %242 = math.rsqrt %241 : vector<16x1xf32>
    %243 = vector.broadcast %242 : vector<16x1xf32> to vector<16x32xf32>
    %244 = arith.mulf %239, %243 : vector<16x32xf32>
    %245 = vector.broadcast %224 : vector<1x32xf32> to vector<16x32xf32>
    %246 = arith.mulf %244, %245 : vector<16x32xf32>
    %247 = vector.broadcast %226 : vector<1x32xf32> to vector<16x32xf32>
    %248 = arith.addf %246, %247 : vector<16x32xf32>
    %c0_90 = arith.constant 0 : index
    %c0_91 = arith.constant 0 : index
    %c0_92 = arith.constant 0 : index
    %249 = vector.load %arg10[%c0_90, %c0_91, %c0_92] : memref<2x32x128xf32, #tpu.memory_space<vmem>>, vector<1x32x128xf32>
    %250 = vector.shape_cast %249 : vector<1x32x128xf32> to vector<32x128xf32>
    %cst_93 = arith.constant dense<0.000000e+00> : vector<16x128xf32>
    %251 = tpu.matmul %248, %250, %cst_93 {dimension_numbers = #tpu.dot_dimension_numbers<[1], [0], [0], [1], [0, 0, 1, 1], [], []>} : vector<16x32xf32>, vector<32x128xf32>, vector<16x128xf32> -> vector<16x128xf32>
    %c0_94 = arith.constant 0 : index
    %c0_95 = arith.constant 0 : index
    %c0_96 = arith.constant 0 : index
    %252 = vector.load %arg11[%c0_94, %c0_95, %c0_96] : memref<2x1x128xf32, #tpu.memory_space<vmem>>, vector<1x1x128xf32>
    %253 = vector.shape_cast %252 : vector<1x1x128xf32> to vector<1x128xf32>
    %254 = vector.broadcast %253 : vector<1x128xf32> to vector<16x128xf32>
    %255 = arith.addf %251, %254 : vector<16x128xf32>
    %256 = arith.mulf %255, %255 : vector<16x128xf32>
    %257 = arith.mulf %255, %256 : vector<16x128xf32>
    %cst_97 = arith.constant 4.471500e-02 : f32
    %258 = vector.broadcast %cst_97 : f32 to vector<16x128xf32>
    %259 = arith.mulf %258, %257 : vector<16x128xf32>
    %260 = arith.addf %255, %259 : vector<16x128xf32>
    %cst_98 = arith.constant 0.797884583 : f32
    %261 = vector.broadcast %cst_98 : f32 to vector<16x128xf32>
    %262 = arith.mulf %261, %260 : vector<16x128xf32>
    %263 = math.tanh %262 : vector<16x128xf32>
    %cst_99 = arith.constant 1.000000e+00 : f32
    %264 = vector.broadcast %cst_99 : f32 to vector<16x128xf32>
    %265 = arith.addf %264, %263 : vector<16x128xf32>
    %cst_100 = arith.constant 5.000000e-01 : f32
    %266 = vector.broadcast %cst_100 : f32 to vector<16x128xf32>
    %267 = arith.mulf %266, %265 : vector<16x128xf32>
    %268 = arith.mulf %255, %267 : vector<16x128xf32>
    %c0_101 = arith.constant 0 : index
    %c0_102 = arith.constant 0 : index
    %c0_103 = arith.constant 0 : index
    %269 = vector.load %arg12[%c0_101, %c0_102, %c0_103] : memref<2x128x32xf32, #tpu.memory_space<vmem>>, vector<1x128x32xf32>
    %270 = vector.shape_cast %269 : vector<1x128x32xf32> to vector<128x32xf32>
    %cst_104 = arith.constant dense<0.000000e+00> : vector<16x32xf32>
    %271 = tpu.matmul %268, %270, %cst_104 {dimension_numbers = #tpu.dot_dimension_numbers<[1], [0], [0], [1], [0, 0, 1, 1], [], []>} : vector<16x128xf32>, vector<128x32xf32>, vector<16x32xf32> -> vector<16x32xf32>
    %c0_105 = arith.constant 0 : index
    %c0_106 = arith.constant 0 : index
    %c0_107 = arith.constant 0 : index
    %272 = vector.load %arg13[%c0_105, %c0_106, %c0_107] : memref<2x1x32xf32, #tpu.memory_space<vmem>>, vector<1x1x32xf32>
    %273 = vector.shape_cast %272 : vector<1x1x32xf32> to vector<1x32xf32>
    %274 = vector.broadcast %273 : vector<1x32xf32> to vector<16x32xf32>
    %275 = arith.addf %271, %274 : vector<16x32xf32>
    %276 = arith.addf %275, %248 : vector<16x32xf32>
    %c0_108 = arith.constant 0 : index
    %c0_109 = arith.constant 0 : index
    %c0_110 = arith.constant 0 : index
    %277 = vector.load %arg14[%c0_108, %c0_109, %c0_110] : memref<2x1x32xf32, #tpu.memory_space<vmem>>, vector<1x1x32xf32>
    %278 = vector.shape_cast %277 : vector<1x1x32xf32> to vector<1x32xf32>
    %c0_111 = arith.constant 0 : index
    %c0_112 = arith.constant 0 : index
    %c0_113 = arith.constant 0 : index
    %279 = vector.load %arg15[%c0_111, %c0_112, %c0_113] : memref<2x1x32xf32, #tpu.memory_space<vmem>>, vector<1x1x32xf32>
    %280 = vector.shape_cast %279 : vector<1x1x32xf32> to vector<1x32xf32>
    %cst_114 = arith.constant dense<0.000000e+00> : vector<16xf32>
    %281 = vector.multi_reduction <add>, %276, %cst_114 [1] : vector<16x32xf32> to vector<16xf32>
    %282 = vector.shape_cast %281 : vector<16xf32> to vector<16x1xf32>
    %cst_115 = arith.constant 3.200000e+01 : f32
    %283 = vector.broadcast %cst_115 : f32 to vector<16x1xf32>
    %284 = arith.divf %282, %283 : vector<16x1xf32>
    %285 = vector.broadcast %284 : vector<16x1xf32> to vector<16x32xf32>
    %286 = arith.subf %276, %285 : vector<16x32xf32>
    %287 = arith.mulf %286, %286 : vector<16x32xf32>
    %cst_116 = arith.constant dense<0.000000e+00> : vector<16xf32>
    %288 = vector.multi_reduction <add>, %287, %cst_116 [1] : vector<16x32xf32> to vector<16xf32>
    %289 = vector.shape_cast %288 : vector<16xf32> to vector<16x1xf32>
    %cst_117 = arith.constant 3.200000e+01 : f32
    %290 = vector.broadcast %cst_117 : f32 to vector<16x1xf32>
    %291 = arith.divf %289, %290 : vector<16x1xf32>
    %292 = vector.broadcast %284 : vector<16x1xf32> to vector<16x32xf32>
    %293 = arith.subf %276, %292 : vector<16x32xf32>
    %cst_118 = arith.constant 9.99999974E-6 : f32
    %294 = vector.broadcast %cst_118 : f32 to vector<16x1xf32>
    %295 = arith.addf %291, %294 : vector<16x1xf32>
    %296 = math.rsqrt %295 : vector<16x1xf32>
    %297 = vector.broadcast %296 : vector<16x1xf32> to vector<16x32xf32>
    %298 = arith.mulf %293, %297 : vector<16x32xf32>
    %299 = vector.broadcast %278 : vector<1x32xf32> to vector<16x32xf32>
    %300 = arith.mulf %298, %299 : vector<16x32xf32>
    %301 = vector.broadcast %280 : vector<1x32xf32> to vector<16x32xf32>
    %302 = arith.addf %300, %301 : vector<16x32xf32>
    %c1 = arith.constant 1 : index
    %c0_119 = arith.constant 0 : index
    %c0_120 = arith.constant 0 : index
    %303 = vector.load %arg4[%c1, %c0_119, %c0_120] : memref<2x32x96xf32, #tpu.memory_space<vmem>>, vector<1x32x96xf32>
    %304 = vector.shape_cast %303 : vector<1x32x96xf32> to vector<32x96xf32>
    %c1_121 = arith.constant 1 : index
    %c0_122 = arith.constant 0 : index
    %c0_123 = arith.constant 0 : index
    %305 = vector.load %arg5[%c1_121, %c0_122, %c0_123] : memref<2x1x96xf32, #tpu.memory_space<vmem>>, vector<1x1x96xf32>
    %306 = vector.shape_cast %305 : vector<1x1x96xf32> to vector<1x96xf32>
    %c1_124 = arith.constant 1 : index
    %c0_125 = arith.constant 0 : index
    %c0_126 = arith.constant 0 : index
    %307 = vector.load %arg6[%c1_124, %c0_125, %c0_126] : memref<2x32x32xf32, #tpu.memory_space<vmem>>, vector<1x32x32xf32>
    %308 = vector.shape_cast %307 : vector<1x32x32xf32> to vector<32x32xf32>
    %c1_127 = arith.constant 1 : index
    %c0_128 = arith.constant 0 : index
    %c0_129 = arith.constant 0 : index
    %309 = vector.load %arg7[%c1_127, %c0_128, %c0_129] : memref<2x1x32xf32, #tpu.memory_space<vmem>>, vector<1x1x32xf32>
    %310 = vector.shape_cast %309 : vector<1x1x32xf32> to vector<1x32xf32>
    %cst_130 = arith.constant dense<0.000000e+00> : vector<16x96xf32>
    %311 = tpu.matmul %302, %304, %cst_130 {dimension_numbers = #tpu.dot_dimension_numbers<[1], [0], [0], [1], [0, 0, 1, 1], [], []>} : vector<16x32xf32>, vector<32x96xf32>, vector<16x96xf32> -> vector<16x96xf32>
    %312 = vector.broadcast %306 : vector<1x96xf32> to vector<16x96xf32>
    %313 = arith.addf %311, %312 : vector<16x96xf32>
    %314 = vector.extract_strided_slice %0 {offsets = [0, 0], sizes = [1, 8], strides = [1, 1]} : vector<2x8xf32> to vector<1x8xf32>
    %cst_131 = arith.constant 0.000000e+00 : f32
    %315 = vector.broadcast %cst_131 : f32 to vector<8x32xf32>
    %316 = vector.extract_strided_slice %313 {offsets = [0, 0], sizes = [8, 8], strides = [1, 1]} : vector<16x96xf32> to vector<8x8xf32>
    %317 = vector.extract_strided_slice %313 {offsets = [0, 32], sizes = [8, 8], strides = [1, 1]} : vector<16x96xf32> to vector<8x8xf32>
    %318 = vector.extract_strided_slice %313 {offsets = [0, 64], sizes = [8, 8], strides = [1, 1]} : vector<16x96xf32> to vector<8x8xf32>
    %cst_132 = arith.constant dense<0.000000e+00> : vector<8x8xf32>
    %319 = tpu.matmul %316, %317, %cst_132 {dimension_numbers = #tpu.dot_dimension_numbers<[1], [1], [0], [0], [0, 0, 1, 0], [], []>} : vector<8x8xf32>, vector<8x8xf32>, vector<8x8xf32> -> vector<8x8xf32>
    %cst_133 = arith.constant 0.353553385 : f32
    %320 = vector.broadcast %cst_133 : f32 to vector<8x8xf32>
    %321 = arith.mulf %319, %320 : vector<8x8xf32>
    %322 = vector.broadcast %314 : vector<1x8xf32> to vector<8x8xf32>
    %323 = arith.addf %321, %322 : vector<8x8xf32>
    %cst_134 = arith.constant dense<0xFF800000> : vector<8xf32>
    %324 = vector.multi_reduction <maximumf>, %323, %cst_134 [1] : vector<8x8xf32> to vector<8xf32>
    %325 = vector.shape_cast %324 : vector<8xf32> to vector<8x1xf32>
    %326 = vector.broadcast %325 : vector<8x1xf32> to vector<8x8xf32>
    %327 = arith.subf %323, %326 : vector<8x8xf32>
    %328 = math.exp %327 : vector<8x8xf32>
    %cst_135 = arith.constant dense<0.000000e+00> : vector<8xf32>
    %329 = vector.multi_reduction <add>, %328, %cst_135 [1] : vector<8x8xf32> to vector<8xf32>
    %330 = vector.shape_cast %329 : vector<8xf32> to vector<8x1xf32>
    %331 = tpu.reciprocal %330 {approx = true} : vector<8x1xf32> -> vector<8x1xf32>
    %332 = vector.broadcast %331 : vector<8x1xf32> to vector<8x8xf32>
    %333 = arith.mulf %328, %332 : vector<8x8xf32>
    %cst_136 = arith.constant dense<0.000000e+00> : vector<8x8xf32>
    %334 = tpu.matmul %333, %318, %cst_136 {dimension_numbers = #tpu.dot_dimension_numbers<[1], [0], [0], [1], [0, 0, 1, 1], [], []>} : vector<8x8xf32>, vector<8x8xf32>, vector<8x8xf32> -> vector<8x8xf32>
    %335 = vector.extract_strided_slice %308 {offsets = [0, 0], sizes = [8, 32], strides = [1, 1]} : vector<32x32xf32> to vector<8x32xf32>
    %cst_137 = arith.constant dense<0.000000e+00> : vector<8x32xf32>
    %336 = tpu.matmul %334, %335, %cst_137 {dimension_numbers = #tpu.dot_dimension_numbers<[1], [0], [0], [1], [0, 0, 1, 1], [], []>} : vector<8x8xf32>, vector<8x32xf32>, vector<8x32xf32> -> vector<8x32xf32>
    %337 = arith.addf %315, %336 : vector<8x32xf32>
    %338 = vector.extract_strided_slice %313 {offsets = [0, 8], sizes = [8, 8], strides = [1, 1]} : vector<16x96xf32> to vector<8x8xf32>
    %339 = vector.extract_strided_slice %313 {offsets = [0, 40], sizes = [8, 8], strides = [1, 1]} : vector<16x96xf32> to vector<8x8xf32>
    %340 = vector.extract_strided_slice %313 {offsets = [0, 72], sizes = [8, 8], strides = [1, 1]} : vector<16x96xf32> to vector<8x8xf32>
    %cst_138 = arith.constant dense<0.000000e+00> : vector<8x8xf32>
    %341 = tpu.matmul %338, %339, %cst_138 {dimension_numbers = #tpu.dot_dimension_numbers<[1], [1], [0], [0], [0, 0, 1, 0], [], []>} : vector<8x8xf32>, vector<8x8xf32>, vector<8x8xf32> -> vector<8x8xf32>
    %cst_139 = arith.constant 0.353553385 : f32
    %342 = vector.broadcast %cst_139 : f32 to vector<8x8xf32>
    %343 = arith.mulf %341, %342 : vector<8x8xf32>
    %344 = vector.broadcast %314 : vector<1x8xf32> to vector<8x8xf32>
    %345 = arith.addf %343, %344 : vector<8x8xf32>
    %cst_140 = arith.constant dense<0xFF800000> : vector<8xf32>
    %346 = vector.multi_reduction <maximumf>, %345, %cst_140 [1] : vector<8x8xf32> to vector<8xf32>
    %347 = vector.shape_cast %346 : vector<8xf32> to vector<8x1xf32>
    %348 = vector.broadcast %347 : vector<8x1xf32> to vector<8x8xf32>
    %349 = arith.subf %345, %348 : vector<8x8xf32>
    %350 = math.exp %349 : vector<8x8xf32>
    %cst_141 = arith.constant dense<0.000000e+00> : vector<8xf32>
    %351 = vector.multi_reduction <add>, %350, %cst_141 [1] : vector<8x8xf32> to vector<8xf32>
    %352 = vector.shape_cast %351 : vector<8xf32> to vector<8x1xf32>
    %353 = tpu.reciprocal %352 {approx = true} : vector<8x1xf32> -> vector<8x1xf32>
    %354 = vector.broadcast %353 : vector<8x1xf32> to vector<8x8xf32>
    %355 = arith.mulf %350, %354 : vector<8x8xf32>
    %cst_142 = arith.constant dense<0.000000e+00> : vector<8x8xf32>
    %356 = tpu.matmul %355, %340, %cst_142 {dimension_numbers = #tpu.dot_dimension_numbers<[1], [0], [0], [1], [0, 0, 1, 1], [], []>} : vector<8x8xf32>, vector<8x8xf32>, vector<8x8xf32> -> vector<8x8xf32>
    %357 = vector.extract_strided_slice %308 {offsets = [8, 0], sizes = [8, 32], strides = [1, 1]} : vector<32x32xf32> to vector<8x32xf32>
    %cst_143 = arith.constant dense<0.000000e+00> : vector<8x32xf32>
    %358 = tpu.matmul %356, %357, %cst_143 {dimension_numbers = #tpu.dot_dimension_numbers<[1], [0], [0], [1], [0, 0, 1, 1], [], []>} : vector<8x8xf32>, vector<8x32xf32>, vector<8x32xf32> -> vector<8x32xf32>
    %359 = arith.addf %337, %358 : vector<8x32xf32>
    %360 = vector.extract_strided_slice %313 {offsets = [0, 16], sizes = [8, 8], strides = [1, 1]} : vector<16x96xf32> to vector<8x8xf32>
    %361 = vector.extract_strided_slice %313 {offsets = [0, 48], sizes = [8, 8], strides = [1, 1]} : vector<16x96xf32> to vector<8x8xf32>
    %362 = vector.extract_strided_slice %313 {offsets = [0, 80], sizes = [8, 8], strides = [1, 1]} : vector<16x96xf32> to vector<8x8xf32>
    %cst_144 = arith.constant dense<0.000000e+00> : vector<8x8xf32>
    %363 = tpu.matmul %360, %361, %cst_144 {dimension_numbers = #tpu.dot_dimension_numbers<[1], [1], [0], [0], [0, 0, 1, 0], [], []>} : vector<8x8xf32>, vector<8x8xf32>, vector<8x8xf32> -> vector<8x8xf32>
    %cst_145 = arith.constant 0.353553385 : f32
    %364 = vector.broadcast %cst_145 : f32 to vector<8x8xf32>
    %365 = arith.mulf %363, %364 : vector<8x8xf32>
    %366 = vector.broadcast %314 : vector<1x8xf32> to vector<8x8xf32>
    %367 = arith.addf %365, %366 : vector<8x8xf32>
    %cst_146 = arith.constant dense<0xFF800000> : vector<8xf32>
    %368 = vector.multi_reduction <maximumf>, %367, %cst_146 [1] : vector<8x8xf32> to vector<8xf32>
    %369 = vector.shape_cast %368 : vector<8xf32> to vector<8x1xf32>
    %370 = vector.broadcast %369 : vector<8x1xf32> to vector<8x8xf32>
    %371 = arith.subf %367, %370 : vector<8x8xf32>
    %372 = math.exp %371 : vector<8x8xf32>
    %cst_147 = arith.constant dense<0.000000e+00> : vector<8xf32>
    %373 = vector.multi_reduction <add>, %372, %cst_147 [1] : vector<8x8xf32> to vector<8xf32>
    %374 = vector.shape_cast %373 : vector<8xf32> to vector<8x1xf32>
    %375 = tpu.reciprocal %374 {approx = true} : vector<8x1xf32> -> vector<8x1xf32>
    %376 = vector.broadcast %375 : vector<8x1xf32> to vector<8x8xf32>
    %377 = arith.mulf %372, %376 : vector<8x8xf32>
    %cst_148 = arith.constant dense<0.000000e+00> : vector<8x8xf32>
    %378 = tpu.matmul %377, %362, %cst_148 {dimension_numbers = #tpu.dot_dimension_numbers<[1], [0], [0], [1], [0, 0, 1, 1], [], []>} : vector<8x8xf32>, vector<8x8xf32>, vector<8x8xf32> -> vector<8x8xf32>
    %379 = vector.extract_strided_slice %308 {offsets = [16, 0], sizes = [8, 32], strides = [1, 1]} : vector<32x32xf32> to vector<8x32xf32>
    %cst_149 = arith.constant dense<0.000000e+00> : vector<8x32xf32>
    %380 = tpu.matmul %378, %379, %cst_149 {dimension_numbers = #tpu.dot_dimension_numbers<[1], [0], [0], [1], [0, 0, 1, 1], [], []>} : vector<8x8xf32>, vector<8x32xf32>, vector<8x32xf32> -> vector<8x32xf32>
    %381 = arith.addf %359, %380 : vector<8x32xf32>
    %382 = vector.extract_strided_slice %313 {offsets = [0, 24], sizes = [8, 8], strides = [1, 1]} : vector<16x96xf32> to vector<8x8xf32>
    %383 = vector.extract_strided_slice %313 {offsets = [0, 56], sizes = [8, 8], strides = [1, 1]} : vector<16x96xf32> to vector<8x8xf32>
    %384 = vector.extract_strided_slice %313 {offsets = [0, 88], sizes = [8, 8], strides = [1, 1]} : vector<16x96xf32> to vector<8x8xf32>
    %cst_150 = arith.constant dense<0.000000e+00> : vector<8x8xf32>
    %385 = tpu.matmul %382, %383, %cst_150 {dimension_numbers = #tpu.dot_dimension_numbers<[1], [1], [0], [0], [0, 0, 1, 0], [], []>} : vector<8x8xf32>, vector<8x8xf32>, vector<8x8xf32> -> vector<8x8xf32>
    %cst_151 = arith.constant 0.353553385 : f32
    %386 = vector.broadcast %cst_151 : f32 to vector<8x8xf32>
    %387 = arith.mulf %385, %386 : vector<8x8xf32>
    %388 = vector.broadcast %314 : vector<1x8xf32> to vector<8x8xf32>
    %389 = arith.addf %387, %388 : vector<8x8xf32>
    %cst_152 = arith.constant dense<0xFF800000> : vector<8xf32>
    %390 = vector.multi_reduction <maximumf>, %389, %cst_152 [1] : vector<8x8xf32> to vector<8xf32>
    %391 = vector.shape_cast %390 : vector<8xf32> to vector<8x1xf32>
    %392 = vector.broadcast %391 : vector<8x1xf32> to vector<8x8xf32>
    %393 = arith.subf %389, %392 : vector<8x8xf32>
    %394 = math.exp %393 : vector<8x8xf32>
    %cst_153 = arith.constant dense<0.000000e+00> : vector<8xf32>
    %395 = vector.multi_reduction <add>, %394, %cst_153 [1] : vector<8x8xf32> to vector<8xf32>
    %396 = vector.shape_cast %395 : vector<8xf32> to vector<8x1xf32>
    %397 = tpu.reciprocal %396 {approx = true} : vector<8x1xf32> -> vector<8x1xf32>
    %398 = vector.broadcast %397 : vector<8x1xf32> to vector<8x8xf32>
    %399 = arith.mulf %394, %398 : vector<8x8xf32>
    %cst_154 = arith.constant dense<0.000000e+00> : vector<8x8xf32>
    %400 = tpu.matmul %399, %384, %cst_154 {dimension_numbers = #tpu.dot_dimension_numbers<[1], [0], [0], [1], [0, 0, 1, 1], [], []>} : vector<8x8xf32>, vector<8x8xf32>, vector<8x8xf32> -> vector<8x8xf32>
    %401 = vector.extract_strided_slice %308 {offsets = [24, 0], sizes = [8, 32], strides = [1, 1]} : vector<32x32xf32> to vector<8x32xf32>
    %cst_155 = arith.constant dense<0.000000e+00> : vector<8x32xf32>
    %402 = tpu.matmul %400, %401, %cst_155 {dimension_numbers = #tpu.dot_dimension_numbers<[1], [0], [0], [1], [0, 0, 1, 1], [], []>} : vector<8x8xf32>, vector<8x32xf32>, vector<8x32xf32> -> vector<8x32xf32>
    %403 = arith.addf %381, %402 : vector<8x32xf32>
    %c0_156 = arith.constant 0 : index
    %c0_157 = arith.constant 0 : index
    %404 = vector.load %arg21[%c0_156, %c0_157] : memref<16x32xf32, #tpu.memory_space<vmem>>, vector<8x32xf32>
    tpu.vector_store %arg21[%c0_156, %c0_157], %403 {strides = array<i32>} : memref<16x32xf32, #tpu.memory_space<vmem>>, vector<8x32xf32>,
    %405 = vector.extract_strided_slice %0 {offsets = [1, 0], sizes = [1, 8], strides = [1, 1]} : vector<2x8xf32> to vector<1x8xf32>
    %cst_158 = arith.constant 0.000000e+00 : f32
    %406 = vector.broadcast %cst_158 : f32 to vector<8x32xf32>
    %407 = vector.extract_strided_slice %313 {offsets = [8, 0], sizes = [8, 8], strides = [1, 1]} : vector<16x96xf32> to vector<8x8xf32>
    %408 = vector.extract_strided_slice %313 {offsets = [8, 32], sizes = [8, 8], strides = [1, 1]} : vector<16x96xf32> to vector<8x8xf32>
    %409 = vector.extract_strided_slice %313 {offsets = [8, 64], sizes = [8, 8], strides = [1, 1]} : vector<16x96xf32> to vector<8x8xf32>
    %cst_159 = arith.constant dense<0.000000e+00> : vector<8x8xf32>
    %410 = tpu.matmul %407, %408, %cst_159 {dimension_numbers = #tpu.dot_dimension_numbers<[1], [1], [0], [0], [0, 0, 1, 0], [], []>} : vector<8x8xf32>, vector<8x8xf32>, vector<8x8xf32> -> vector<8x8xf32>
    %cst_160 = arith.constant 0.353553385 : f32
    %411 = vector.broadcast %cst_160 : f32 to vector<8x8xf32>
    %412 = arith.mulf %410, %411 : vector<8x8xf32>
    %413 = vector.broadcast %405 : vector<1x8xf32> to vector<8x8xf32>
    %414 = arith.addf %412, %413 : vector<8x8xf32>
    %cst_161 = arith.constant dense<0xFF800000> : vector<8xf32>
    %415 = vector.multi_reduction <maximumf>, %414, %cst_161 [1] : vector<8x8xf32> to vector<8xf32>
    %416 = vector.shape_cast %415 : vector<8xf32> to vector<8x1xf32>
    %417 = vector.broadcast %416 : vector<8x1xf32> to vector<8x8xf32>
    %418 = arith.subf %414, %417 : vector<8x8xf32>
    %419 = math.exp %418 : vector<8x8xf32>
    %cst_162 = arith.constant dense<0.000000e+00> : vector<8xf32>
    %420 = vector.multi_reduction <add>, %419, %cst_162 [1] : vector<8x8xf32> to vector<8xf32>
    %421 = vector.shape_cast %420 : vector<8xf32> to vector<8x1xf32>
    %422 = tpu.reciprocal %421 {approx = true} : vector<8x1xf32> -> vector<8x1xf32>
    %423 = vector.broadcast %422 : vector<8x1xf32> to vector<8x8xf32>
    %424 = arith.mulf %419, %423 : vector<8x8xf32>
    %cst_163 = arith.constant dense<0.000000e+00> : vector<8x8xf32>
    %425 = tpu.matmul %424, %409, %cst_163 {dimension_numbers = #tpu.dot_dimension_numbers<[1], [0], [0], [1], [0, 0, 1, 1], [], []>} : vector<8x8xf32>, vector<8x8xf32>, vector<8x8xf32> -> vector<8x8xf32>
    %426 = vector.extract_strided_slice %308 {offsets = [0, 0], sizes = [8, 32], strides = [1, 1]} : vector<32x32xf32> to vector<8x32xf32>
    %cst_164 = arith.constant dense<0.000000e+00> : vector<8x32xf32>
    %427 = tpu.matmul %425, %426, %cst_164 {dimension_numbers = #tpu.dot_dimension_numbers<[1], [0], [0], [1], [0, 0, 1, 1], [], []>} : vector<8x8xf32>, vector<8x32xf32>, vector<8x32xf32> -> vector<8x32xf32>
    %428 = arith.addf %406, %427 : vector<8x32xf32>
    %429 = vector.extract_strided_slice %313 {offsets = [8, 8], sizes = [8, 8], strides = [1, 1]} : vector<16x96xf32> to vector<8x8xf32>
    %430 = vector.extract_strided_slice %313 {offsets = [8, 40], sizes = [8, 8], strides = [1, 1]} : vector<16x96xf32> to vector<8x8xf32>
    %431 = vector.extract_strided_slice %313 {offsets = [8, 72], sizes = [8, 8], strides = [1, 1]} : vector<16x96xf32> to vector<8x8xf32>
    %cst_165 = arith.constant dense<0.000000e+00> : vector<8x8xf32>
    %432 = tpu.matmul %429, %430, %cst_165 {dimension_numbers = #tpu.dot_dimension_numbers<[1], [1], [0], [0], [0, 0, 1, 0], [], []>} : vector<8x8xf32>, vector<8x8xf32>, vector<8x8xf32> -> vector<8x8xf32>
    %cst_166 = arith.constant 0.353553385 : f32
    %433 = vector.broadcast %cst_166 : f32 to vector<8x8xf32>
    %434 = arith.mulf %432, %433 : vector<8x8xf32>
    %435 = vector.broadcast %405 : vector<1x8xf32> to vector<8x8xf32>
    %436 = arith.addf %434, %435 : vector<8x8xf32>
    %cst_167 = arith.constant dense<0xFF800000> : vector<8xf32>
    %437 = vector.multi_reduction <maximumf>, %436, %cst_167 [1] : vector<8x8xf32> to vector<8xf32>
    %438 = vector.shape_cast %437 : vector<8xf32> to vector<8x1xf32>
    %439 = vector.broadcast %438 : vector<8x1xf32> to vector<8x8xf32>
    %440 = arith.subf %436, %439 : vector<8x8xf32>
    %441 = math.exp %440 : vector<8x8xf32>
    %cst_168 = arith.constant dense<0.000000e+00> : vector<8xf32>
    %442 = vector.multi_reduction <add>, %441, %cst_168 [1] : vector<8x8xf32> to vector<8xf32>
    %443 = vector.shape_cast %442 : vector<8xf32> to vector<8x1xf32>
    %444 = tpu.reciprocal %443 {approx = true} : vector<8x1xf32> -> vector<8x1xf32>
    %445 = vector.broadcast %444 : vector<8x1xf32> to vector<8x8xf32>
    %446 = arith.mulf %441, %445 : vector<8x8xf32>
    %cst_169 = arith.constant dense<0.000000e+00> : vector<8x8xf32>
    %447 = tpu.matmul %446, %431, %cst_169 {dimension_numbers = #tpu.dot_dimension_numbers<[1], [0], [0], [1], [0, 0, 1, 1], [], []>} : vector<8x8xf32>, vector<8x8xf32>, vector<8x8xf32> -> vector<8x8xf32>
    %448 = vector.extract_strided_slice %308 {offsets = [8, 0], sizes = [8, 32], strides = [1, 1]} : vector<32x32xf32> to vector<8x32xf32>
    %cst_170 = arith.constant dense<0.000000e+00> : vector<8x32xf32>
    %449 = tpu.matmul %447, %448, %cst_170 {dimension_numbers = #tpu.dot_dimension_numbers<[1], [0], [0], [1], [0, 0, 1, 1], [], []>} : vector<8x8xf32>, vector<8x32xf32>, vector<8x32xf32> -> vector<8x32xf32>
    %450 = arith.addf %428, %449 : vector<8x32xf32>
    %451 = vector.extract_strided_slice %313 {offsets = [8, 16], sizes = [8, 8], strides = [1, 1]} : vector<16x96xf32> to vector<8x8xf32>
    %452 = vector.extract_strided_slice %313 {offsets = [8, 48], sizes = [8, 8], strides = [1, 1]} : vector<16x96xf32> to vector<8x8xf32>
    %453 = vector.extract_strided_slice %313 {offsets = [8, 80], sizes = [8, 8], strides = [1, 1]} : vector<16x96xf32> to vector<8x8xf32>
    %cst_171 = arith.constant dense<0.000000e+00> : vector<8x8xf32>
    %454 = tpu.matmul %451, %452, %cst_171 {dimension_numbers = #tpu.dot_dimension_numbers<[1], [1], [0], [0], [0, 0, 1, 0], [], []>} : vector<8x8xf32>, vector<8x8xf32>, vector<8x8xf32> -> vector<8x8xf32>
    %cst_172 = arith.constant 0.353553385 : f32
    %455 = vector.broadcast %cst_172 : f32 to vector<8x8xf32>
    %456 = arith.mulf %454, %455 : vector<8x8xf32>
    %457 = vector.broadcast %405 : vector<1x8xf32> to vector<8x8xf32>
    %458 = arith.addf %456, %457 : vector<8x8xf32>
    %cst_173 = arith.constant dense<0xFF800000> : vector<8xf32>
    %459 = vector.multi_reduction <maximumf>, %458, %cst_173 [1] : vector<8x8xf32> to vector<8xf32>
    %460 = vector.shape_cast %459 : vector<8xf32> to vector<8x1xf32>
    %461 = vector.broadcast %460 : vector<8x1xf32> to vector<8x8xf32>
    %462 = arith.subf %458, %461 : vector<8x8xf32>
    %463 = math.exp %462 : vector<8x8xf32>
    %cst_174 = arith.constant dense<0.000000e+00> : vector<8xf32>
    %464 = vector.multi_reduction <add>, %463, %cst_174 [1] : vector<8x8xf32> to vector<8xf32>
    %465 = vector.shape_cast %464 : vector<8xf32> to vector<8x1xf32>
    %466 = tpu.reciprocal %465 {approx = true} : vector<8x1xf32> -> vector<8x1xf32>
    %467 = vector.broadcast %466 : vector<8x1xf32> to vector<8x8xf32>
    %468 = arith.mulf %463, %467 : vector<8x8xf32>
    %cst_175 = arith.constant dense<0.000000e+00> : vector<8x8xf32>
    %469 = tpu.matmul %468, %453, %cst_175 {dimension_numbers = #tpu.dot_dimension_numbers<[1], [0], [0], [1], [0, 0, 1, 1], [], []>} : vector<8x8xf32>, vector<8x8xf32>, vector<8x8xf32> -> vector<8x8xf32>
    %470 = vector.extract_strided_slice %308 {offsets = [16, 0], sizes = [8, 32], strides = [1, 1]} : vector<32x32xf32> to vector<8x32xf32>
    %cst_176 = arith.constant dense<0.000000e+00> : vector<8x32xf32>
    %471 = tpu.matmul %469, %470, %cst_176 {dimension_numbers = #tpu.dot_dimension_numbers<[1], [0], [0], [1], [0, 0, 1, 1], [], []>} : vector<8x8xf32>, vector<8x32xf32>, vector<8x32xf32> -> vector<8x32xf32>
    %472 = arith.addf %450, %471 : vector<8x32xf32>
    %473 = vector.extract_strided_slice %313 {offsets = [8, 24], sizes = [8, 8], strides = [1, 1]} : vector<16x96xf32> to vector<8x8xf32>
    %474 = vector.extract_strided_slice %313 {offsets = [8, 56], sizes = [8, 8], strides = [1, 1]} : vector<16x96xf32> to vector<8x8xf32>
    %475 = vector.extract_strided_slice %313 {offsets = [8, 88], sizes = [8, 8], strides = [1, 1]} : vector<16x96xf32> to vector<8x8xf32>
    %cst_177 = arith.constant dense<0.000000e+00> : vector<8x8xf32>
    %476 = tpu.matmul %473, %474, %cst_177 {dimension_numbers = #tpu.dot_dimension_numbers<[1], [1], [0], [0], [0, 0, 1, 0], [], []>} : vector<8x8xf32>, vector<8x8xf32>, vector<8x8xf32> -> vector<8x8xf32>
    %cst_178 = arith.constant 0.353553385 : f32
    %477 = vector.broadcast %cst_178 : f32 to vector<8x8xf32>
    %478 = arith.mulf %476, %477 : vector<8x8xf32>
    %479 = vector.broadcast %405 : vector<1x8xf32> to vector<8x8xf32>
    %480 = arith.addf %478, %479 : vector<8x8xf32>
    %cst_179 = arith.constant dense<0xFF800000> : vector<8xf32>
    %481 = vector.multi_reduction <maximumf>, %480, %cst_179 [1] : vector<8x8xf32> to vector<8xf32>
    %482 = vector.shape_cast %481 : vector<8xf32> to vector<8x1xf32>
    %483 = vector.broadcast %482 : vector<8x1xf32> to vector<8x8xf32>
    %484 = arith.subf %480, %483 : vector<8x8xf32>
    %485 = math.exp %484 : vector<8x8xf32>
    %cst_180 = arith.constant dense<0.000000e+00> : vector<8xf32>
    %486 = vector.multi_reduction <add>, %485, %cst_180 [1] : vector<8x8xf32> to vector<8xf32>
    %487 = vector.shape_cast %486 : vector<8xf32> to vector<8x1xf32>
    %488 = tpu.reciprocal %487 {approx = true} : vector<8x1xf32> -> vector<8x1xf32>
    %489 = vector.broadcast %488 : vector<8x1xf32> to vector<8x8xf32>
    %490 = arith.mulf %485, %489 : vector<8x8xf32>
    %cst_181 = arith.constant dense<0.000000e+00> : vector<8x8xf32>
    %491 = tpu.matmul %490, %475, %cst_181 {dimension_numbers = #tpu.dot_dimension_numbers<[1], [0], [0], [1], [0, 0, 1, 1], [], []>} : vector<8x8xf32>, vector<8x8xf32>, vector<8x8xf32> -> vector<8x8xf32>
    %492 = vector.extract_strided_slice %308 {offsets = [24, 0], sizes = [8, 32], strides = [1, 1]} : vector<32x32xf32> to vector<8x32xf32>
    %cst_182 = arith.constant dense<0.000000e+00> : vector<8x32xf32>
    %493 = tpu.matmul %491, %492, %cst_182 {dimension_numbers = #tpu.dot_dimension_numbers<[1], [0], [0], [1], [0, 0, 1, 1], [], []>} : vector<8x8xf32>, vector<8x32xf32>, vector<8x32xf32> -> vector<8x32xf32>
    %494 = arith.addf %472, %493 : vector<8x32xf32>
    %c8_183 = arith.constant 8 : index
    %c0_184 = arith.constant 0 : index
    %495 = vector.load %arg21[%c8_183, %c0_184] : memref<16x32xf32, #tpu.memory_space<vmem>>, vector<8x32xf32>
    tpu.vector_store %arg21[%c8_183, %c0_184], %494 {strides = array<i32>} : memref<16x32xf32, #tpu.memory_space<vmem>>, vector<8x32xf32>,
    %c0_185 = arith.constant 0 : index
    %c0_186 = arith.constant 0 : index
    %496 = vector.load %arg21[%c0_185, %c0_186] : memref<16x32xf32, #tpu.memory_space<vmem>>, vector<16x32xf32>
    %497 = vector.broadcast %310 : vector<1x32xf32> to vector<16x32xf32>
    %498 = arith.addf %496, %497 : vector<16x32xf32>
    %499 = arith.addf %498, %302 : vector<16x32xf32>
    %c1_187 = arith.constant 1 : index
    %c0_188 = arith.constant 0 : index
    %c0_189 = arith.constant 0 : index
    %500 = vector.load %arg8[%c1_187, %c0_188, %c0_189] : memref<2x1x32xf32, #tpu.memory_space<vmem>>, vector<1x1x32xf32>
    %501 = vector.shape_cast %500 : vector<1x1x32xf32> to vector<1x32xf32>
    %c1_190 = arith.constant 1 : index
    %c0_191 = arith.constant 0 : index
    %c0_192 = arith.constant 0 : index
    %502 = vector.load %arg9[%c1_190, %c0_191, %c0_192] : memref<2x1x32xf32, #tpu.memory_space<vmem>>, vector<1x1x32xf32>
    %503 = vector.shape_cast %502 : vector<1x1x32xf32> to vector<1x32xf32>
    %cst_193 = arith.constant dense<0.000000e+00> : vector<16xf32>
    %504 = vector.multi_reduction <add>, %499, %cst_193 [1] : vector<16x32xf32> to vector<16xf32>
    %505 = vector.shape_cast %504 : vector<16xf32> to vector<16x1xf32>
    %cst_194 = arith.constant 3.200000e+01 : f32
    %506 = vector.broadcast %cst_194 : f32 to vector<16x1xf32>
    %507 = arith.divf %505, %506 : vector<16x1xf32>
    %508 = vector.broadcast %507 : vector<16x1xf32> to vector<16x32xf32>
    %509 = arith.subf %499, %508 : vector<16x32xf32>
    %510 = arith.mulf %509, %509 : vector<16x32xf32>
    %cst_195 = arith.constant dense<0.000000e+00> : vector<16xf32>
    %511 = vector.multi_reduction <add>, %510, %cst_195 [1] : vector<16x32xf32> to vector<16xf32>
    %512 = vector.shape_cast %511 : vector<16xf32> to vector<16x1xf32>
    %cst_196 = arith.constant 3.200000e+01 : f32
    %513 = vector.broadcast %cst_196 : f32 to vector<16x1xf32>
    %514 = arith.divf %512, %513 : vector<16x1xf32>
    %515 = vector.broadcast %507 : vector<16x1xf32> to vector<16x32xf32>
    %516 = arith.subf %499, %515 : vector<16x32xf32>
    %cst_197 = arith.constant 9.99999974E-6 : f32
    %517 = vector.broadcast %cst_197 : f32 to vector<16x1xf32>
    %518 = arith.addf %514, %517 : vector<16x1xf32>
    %519 = math.rsqrt %518 : vector<16x1xf32>
    %520 = vector.broadcast %519 : vector<16x1xf32> to vector<16x32xf32>
    %521 = arith.mulf %516, %520 : vector<16x32xf32>
    %522 = vector.broadcast %501 : vector<1x32xf32> to vector<16x32xf32>
    %523 = arith.mulf %521, %522 : vector<16x32xf32>
    %524 = vector.broadcast %503 : vector<1x32xf32> to vector<16x32xf32>
    %525 = arith.addf %523, %524 : vector<16x32xf32>
    %c1_198 = arith.constant 1 : index
    %c0_199 = arith.constant 0 : index
    %c0_200 = arith.constant 0 : index
    %526 = vector.load %arg10[%c1_198, %c0_199, %c0_200] : memref<2x32x128xf32, #tpu.memory_space<vmem>>, vector<1x32x128xf32>
    %527 = vector.shape_cast %526 : vector<1x32x128xf32> to vector<32x128xf32>
    %cst_201 = arith.constant dense<0.000000e+00> : vector<16x128xf32>
    %528 = tpu.matmul %525, %527, %cst_201 {dimension_numbers = #tpu.dot_dimension_numbers<[1], [0], [0], [1], [0, 0, 1, 1], [], []>} : vector<16x32xf32>, vector<32x128xf32>, vector<16x128xf32> -> vector<16x128xf32>
    %c1_202 = arith.constant 1 : index
    %c0_203 = arith.constant 0 : index
    %c0_204 = arith.constant 0 : index
    %529 = vector.load %arg11[%c1_202, %c0_203, %c0_204] : memref<2x1x128xf32, #tpu.memory_space<vmem>>, vector<1x1x128xf32>
    %530 = vector.shape_cast %529 : vector<1x1x128xf32> to vector<1x128xf32>
    %531 = vector.broadcast %530 : vector<1x128xf32> to vector<16x128xf32>
    %532 = arith.addf %528, %531 : vector<16x128xf32>
    %533 = arith.mulf %532, %532 : vector<16x128xf32>
    %534 = arith.mulf %532, %533 : vector<16x128xf32>
    %cst_205 = arith.constant 4.471500e-02 : f32
    %535 = vector.broadcast %cst_205 : f32 to vector<16x128xf32>
    %536 = arith.mulf %535, %534 : vector<16x128xf32>
    %537 = arith.addf %532, %536 : vector<16x128xf32>
    %cst_206 = arith.constant 0.797884583 : f32
    %538 = vector.broadcast %cst_206 : f32 to vector<16x128xf32>
    %539 = arith.mulf %538, %537 : vector<16x128xf32>
    %540 = math.tanh %539 : vector<16x128xf32>
    %cst_207 = arith.constant 1.000000e+00 : f32
    %541 = vector.broadcast %cst_207 : f32 to vector<16x128xf32>
    %542 = arith.addf %541, %540 : vector<16x128xf32>
    %cst_208 = arith.constant 5.000000e-01 : f32
    %543 = vector.broadcast %cst_208 : f32 to vector<16x128xf32>
    %544 = arith.mulf %543, %542 : vector<16x128xf32>
    %545 = arith.mulf %532, %544 : vector<16x128xf32>
    %c1_209 = arith.constant 1 : index
    %c0_210 = arith.constant 0 : index
    %c0_211 = arith.constant 0 : index
    %546 = vector.load %arg12[%c1_209, %c0_210, %c0_211] : memref<2x128x32xf32, #tpu.memory_space<vmem>>, vector<1x128x32xf32>
    %547 = vector.shape_cast %546 : vector<1x128x32xf32> to vector<128x32xf32>
    %cst_212 = arith.constant dense<0.000000e+00> : vector<16x32xf32>
    %548 = tpu.matmul %545, %547, %cst_212 {dimension_numbers = #tpu.dot_dimension_numbers<[1], [0], [0], [1], [0, 0, 1, 1], [], []>} : vector<16x128xf32>, vector<128x32xf32>, vector<16x32xf32> -> vector<16x32xf32>
    %c1_213 = arith.constant 1 : index
    %c0_214 = arith.constant 0 : index
    %c0_215 = arith.constant 0 : index
    %549 = vector.load %arg13[%c1_213, %c0_214, %c0_215] : memref<2x1x32xf32, #tpu.memory_space<vmem>>, vector<1x1x32xf32>
    %550 = vector.shape_cast %549 : vector<1x1x32xf32> to vector<1x32xf32>
    %551 = vector.broadcast %550 : vector<1x32xf32> to vector<16x32xf32>
    %552 = arith.addf %548, %551 : vector<16x32xf32>
    %553 = arith.addf %552, %525 : vector<16x32xf32>
    %c1_216 = arith.constant 1 : index
    %c0_217 = arith.constant 0 : index
    %c0_218 = arith.constant 0 : index
    %554 = vector.load %arg14[%c1_216, %c0_217, %c0_218] : memref<2x1x32xf32, #tpu.memory_space<vmem>>, vector<1x1x32xf32>
    %555 = vector.shape_cast %554 : vector<1x1x32xf32> to vector<1x32xf32>
    %c1_219 = arith.constant 1 : index
    %c0_220 = arith.constant 0 : index
    %c0_221 = arith.constant 0 : index
    %556 = vector.load %arg15[%c1_219, %c0_220, %c0_221] : memref<2x1x32xf32, #tpu.memory_space<vmem>>, vector<1x1x32xf32>
    %557 = vector.shape_cast %556 : vector<1x1x32xf32> to vector<1x32xf32>
    %cst_222 = arith.constant dense<0.000000e+00> : vector<16xf32>
    %558 = vector.multi_reduction <add>, %553, %cst_222 [1] : vector<16x32xf32> to vector<16xf32>
    %559 = vector.shape_cast %558 : vector<16xf32> to vector<16x1xf32>
    %cst_223 = arith.constant 3.200000e+01 : f32
    %560 = vector.broadcast %cst_223 : f32 to vector<16x1xf32>
    %561 = arith.divf %559, %560 : vector<16x1xf32>
    %562 = vector.broadcast %561 : vector<16x1xf32> to vector<16x32xf32>
    %563 = arith.subf %553, %562 : vector<16x32xf32>
    %564 = arith.mulf %563, %563 : vector<16x32xf32>
    %cst_224 = arith.constant dense<0.000000e+00> : vector<16xf32>
    %565 = vector.multi_reduction <add>, %564, %cst_224 [1] : vector<16x32xf32> to vector<16xf32>
    %566 = vector.shape_cast %565 : vector<16xf32> to vector<16x1xf32>
    %cst_225 = arith.constant 3.200000e+01 : f32
    %567 = vector.broadcast %cst_225 : f32 to vector<16x1xf32>
    %568 = arith.divf %566, %567 : vector<16x1xf32>
    %569 = vector.broadcast %561 : vector<16x1xf32> to vector<16x32xf32>
    %570 = arith.subf %553, %569 : vector<16x32xf32>
    %cst_226 = arith.constant 9.99999974E-6 : f32
    %571 = vector.broadcast %cst_226 : f32 to vector<16x1xf32>
    %572 = arith.addf %568, %571 : vector<16x1xf32>
    %573 = math.rsqrt %572 : vector<16x1xf32>
    %574 = vector.broadcast %573 : vector<16x1xf32> to vector<16x32xf32>
    %575 = arith.mulf %570, %574 : vector<16x32xf32>
    %576 = vector.broadcast %555 : vector<1x32xf32> to vector<16x32xf32>
    %577 = arith.mulf %575, %576 : vector<16x32xf32>
    %578 = vector.broadcast %557 : vector<1x32xf32> to vector<16x32xf32>
    %579 = arith.addf %577, %578 : vector<16x32xf32>
    %c0_227 = arith.constant 0 : index
    %c0_228 = arith.constant 0 : index
    %580 = vector.load %arg16[%c0_227, %c0_228] : memref<32x32xf32, #tpu.memory_space<vmem>>, vector<32x32xf32>
    %cst_229 = arith.constant dense<0.000000e+00> : vector<16x32xf32>
    %581 = tpu.matmul %579, %580, %cst_229 {dimension_numbers = #tpu.dot_dimension_numbers<[1], [0], [0], [1], [0, 0, 1, 1], [], []>} : vector<16x32xf32>, vector<32x32xf32>, vector<16x32xf32> -> vector<16x32xf32>
    %c0_230 = arith.constant 0 : index
    %c0_231 = arith.constant 0 : index
    %582 = vector.load %arg17[%c0_230, %c0_231] : memref<1x32xf32, #tpu.memory_space<vmem>>, vector<1x32xf32>
    %583 = vector.broadcast %582 : vector<1x32xf32> to vector<16x32xf32>
    %584 = arith.addf %581, %583 : vector<16x32xf32>
    %cst_232 = arith.constant 0.000000e+00 : f32
    %585 = vector.broadcast %cst_232 : f32 to vector<16x32xf32>
    %586 = arith.maximumf %584, %585 : vector<16x32xf32>
    %c0_233 = arith.constant 0 : index
    %c0_234 = arith.constant 0 : index
    %587 = vector.load %arg18[%c0_233, %c0_234] : memref<32x16xf32, #tpu.memory_space<vmem>>, vector<32x16xf32>
    %cst_235 = arith.constant dense<0.000000e+00> : vector<16x16xf32>
    %588 = tpu.matmul %586, %587, %cst_235 {dimension_numbers = #tpu.dot_dimension_numbers<[1], [0], [0], [1], [0, 0, 1, 1], [], []>} : vector<16x32xf32>, vector<32x16xf32>, vector<16x16xf32> -> vector<16x16xf32>
    %c0_236 = arith.constant 0 : index
    %c0_237 = arith.constant 0 : index
    %589 = vector.load %arg19[%c0_236, %c0_237] : memref<1x16xf32, #tpu.memory_space<vmem>>, vector<1x16xf32>
    %590 = vector.broadcast %589 : vector<1x16xf32> to vector<16x16xf32>
    %591 = arith.addf %588, %590 : vector<16x16xf32>
    %c0_238 = arith.constant 0 : index
    %c0_239 = arith.constant 0 : index
    %592 = vector.load %arg20[%c0_238, %c0_239] : memref<16x16xf32, #tpu.memory_space<vmem>>, vector<16x16xf32>
    tpu.vector_store %arg20[%c0_238, %c0_239], %591 {strides = array<i32>} : memref<16x16xf32, #tpu.memory_space<vmem>>, vector<16x16xf32>,
    return
  }
}

</mosaic_0001>

<bundles_post_ra>
// kernel: mbti_classifier_forward.1
= control target key start
LH: loop header
LB: loop body
LE: loop exit
PB: predicated region body
PF: predicated region fallthrough
CT: control target
= control target key end

     0   :  { %vm70_vm0 = vcmask 261120   ;;  %v2442_v2 = vmov 32.0   ;;  %s2443_s27 = smov 120   ;;  %s2444_s28 = smov 96   ;;  %vm177_vm5 = vcmask 64512   ;;  %s3220_s0 = inlined_call_operand.vmem [shape: f32[16,32], index: 0, kind: input, shape index: {}]   ;;  %s3221_s2 = inlined_call_operand.vmem [shape: f32[1,32], index: 2, kind: input, shape index: {}]   ;;  %s3222_s3 = inlined_call_operand.vmem [shape: f32[1,32], index: 3, kind: input, shape index: {}]   ;;  %s3223_s5 = inlined_call_operand.vmem [shape: f32[2,1,96], index: 5, kind: input, shape index: {}]   ;;  %s3224_s4 = inlined_call_operand.vmem [shape: f32[2,32,96], index: 4, kind: input, shape index: {}]   ;;  %s3225_s1 = inlined_call_operand.vmem [shape: f32[2,8], index: 1, kind: input, shape index: {}]   ;;  %s3226_s6 = inlined_call_operand.vmem [shape: f32[2,32,32], index: 6, kind: input, shape index: {}]   ;;  %s3227_s7 = inlined_call_operand.vmem [shape: f32[2,1,32], index: 7, kind: input, shape index: {}]   ;;  %s3228_s8 = inlined_call_operand.vmem [shape: f32[2,1,32], index: 8, kind: input, shape index: {}]   ;;  %s3229_s9 = inlined_call_operand.vmem [shape: f32[2,1,32], index: 9, kind: input, shape index: {}]   ;;  %s3230_s11 = inlined_call_operand.vmem [shape: f32[2,1,128], index: 11, kind: input, shape index: {}]   ;;  %s3231_s10 = inlined_call_operand.vmem [shape: f32[2,32,128], index: 10, kind: input, shape index: {}]   ;;  %s3232_s12 = inlined_call_operand.vmem [shape: f32[2,128,32], index: 12, kind: input, shape index: {}]   ;;  %s3233_s13 = inlined_call_operand.vmem [shape: f32[2,1,32], index: 13, kind: input, shape index: {}]   ;;  %s3234_s14 = inlined_call_operand.vmem [shape: f32[2,1,32], index: 14, kind: input, shape index: {}]   ;;  %s3235_s15 = inlined_call_operand.vmem [shape: f32[2,1,32], index: 15, kind: input, shape index: {}]   ;;  %s3236_s17 = inlined_call_operand.vmem [shape: f32[1,32], index: 17, kind: input, shape index: {}]   ;;  %s3237_s16 = inlined_call_operand.vmem [shape: f32[32,32], index: 16, kind: input, shape index: {}]   ;;  %s3238_s18 = inlined_call_operand.vmem [shape: f32[32,16], index: 18, kind: input, shape index: {}]   ;;  %s3239_s19 = inlined_call_operand.vmem [shape: f32[1,16], index: 19, kind: input, shape index: {}]   ;;  %s3240_s20 = inlined_call_operand.vmem [shape: f32[16,16], index: 20, kind: output, shape index: {}]  }
   0x1   :  { %3258 = sst [smem:[#allocation3_spill]] %s3220_s0  ;;  %2348 = vrcp.f32 %v2442_v2  ;;  %v2618_v39 = vld [vmem:[%s3225_s1] sm:$0x3]  ;;  %s2446_s0 = smov 56  }
   0x2   :  { %3259 = sst [smem:[#allocation4_spill]] %s3221_s2  ;;  %v2621_v40 = vperm.slane %v2618_v39, 0  ;;  %s3246_s1 = smov 64  }
   0x3   :  { %3260 = sst [smem:[#allocation5_spill]] %s3222_s3  ;;  %s3256_s2 = smov 80  }
   0x4   :  { %3261 = sst [smem:[#allocation6_spill]] %s3223_s5  ;;  %s3252_s30 = smov 72  }
   0x5   :  { %3262 = sst [smem:[#allocation7_spill]] %s3224_s4  ;;  %s2445_s4 = smov 88  }
   0x6   :  { %s3263_s23 = sld [smem:[#allocation3_spill]]  ;;  %s3244_s22 = smov 48  }
   0x7   :  { %v2349_v3 = vpop.eup %2348  ;;  %s3264_s25 = sld [smem:[#allocation7_spill]]  ;;  %s3248_s5 = smov 40  }
   0x8   :  { %v78_v4 = vmul.f32 32.0, %v2349_v3  ;;  %vm82_vm1 = vweird.f32 %v2349_v3  ;;  %s3265_s21 = sld [smem:[#allocation4_spill]]  ;;  %s3273_s3 = smov 64  }
   0x9   :  { %s3266_s24 = sld [smem:[#allocation5_spill]]  ;;  %s3274_s29 = smov 48  }
   0xa   :  { %v79_v5 = vsub.f32 1.0, %v78_v4  ;;  %s3267_s26 = sld [smem:[#allocation6_spill]] }
   0xc   :  { %v66_v0 = vld [vmem:[%s3263_s23] sm:$0xff]  ;;  %v80_v6 = vmul.f32 %v2349_v3, %v79_v5  ;;  %v67_v61 = vld [vmem:[%s3263_s23 + $0x8] sm:$0xff]  ;;  %s3271_s23 = smov 104  }
   0xd   :  { %v71_v1 = vsel %vm70_vm0, %v66_v0, 0.0  ;;  %v135_v14 = vld [vmem:[%s3264_s25 + $0x18] sm:$0xff]  ;;  %v134_v15 = vld [vmem:[%s3264_s25 + $0x10] sm:$0xff]  ;;  %v133_v16 = vld [vmem:[%s3264_s25 + $0x8] sm:$0xff]  ;;  %v74_v62 = vsel %vm70_vm0, %v67_v61, 0.0 }
   0xe   :  { %72 = vadd.xlane.f32.xlu0 %v71_v1  ;;  %v81_v7 = vadd.f32 %v2349_v3, %v80_v6  ;;  %163 = vmatpush.msra.mxu0 %v135_v14  ;;  %v132_v17 = vld [vmem:[%s3264_s25] sm:$0xff]  ;;  %v2656_v14 = vld [vmem:[%s3226_s6 + $0x8] sm:$0xff] }
   0xf   :  { %v2583_v27 = vld [vmem:[%s3265_s21] ss:$0 sm:$0xff]  ;;  %s3254_s21 = smov 112  }
  0x10   :  { %v2563_v8 = vsel %vm82_vm1, %v2349_v3, %v81_v7  ;;  %164 = vmatpush.msra.mxu0 %v134_v15  ;;  %v2588_v30 = vld [vmem:[%s3266_s24] ss:$0 sm:$0xff]  ;;  %s3250_s24 = smov 104  }
  0x11   :  { %v2599_v33 = vld [vmem:[%s3267_s26] ss:$0 sm:$0xff] }
  0x12   :  { %165 = vmatpush.msra.mxu0 %v133_v16 }
  0x14   :  { %166 = vmatpush.msra.mxu0 %v132_v17 }
  0x81   :  { %v73_v9 = vpop.xlane.xlu0 %72 }
  0x82   :  { %v84_v10 = vmul.f32 %v2563_v8, %v73_v9 }
  0x84   :  { %v86_v11 = vsub.f32 %v66_v0, %v84_v10 }
  0x86   :  { %v88_v12 = vmul.f32 %v86_v11, %v86_v11 }
  0x88   :  { %v90_v13 = vsel %vm70_vm0, %v88_v12, 0.0 }
  0x89   :  { %91 = vadd.xlane.f32.xlu0 %v90_v13  ;;  %v2650_v13 = vld [vmem:[%s3226_s6] sm:$0xff] }
  0xfc   :  { %v92_v18 = vpop.xlane.xlu0 %91 }
  0xfd   :  { %v96_v19 = vmul.f32 %v92_v18, %v2563_v8 }
  0xff   :  { %v98_v20 = vadd.f32 1e-05, %v96_v19 }
 0x101   :  { %2350 = vrsqrt.f32 %v98_v20  ;;  %vm106_vm3 = vweird.f32 %v98_v20 }
 0x107   :  { %v2351_v21 = vpop.eup %2350 }
 0x108   :  { %v101_v22 = vmul.f32 %v2351_v21, %v98_v20  ;;  %vm107_vm2 = vweird.f32 %v2351_v21 }
 0x109   :  { %vm108_vm4 = vmor %vm106_vm3, %vm107_vm2 }
 0x10a   :  { %v102_v23 = vmul.f32 %v2351_v21, %v101_v22 }
 0x10c   :  { %v103_v24 = vmul.f32 0.5, %v102_v23 }
 0x10e   :  { %v104_v25 = vsub.f32 1.5, %v103_v24 }
 0x110   :  { %v105_v26 = vmul.f32 %v2351_v21, %v104_v25 }
 0x112   :  { %v109_v28 = vsel %vm108_vm4, %v2351_v21, %v105_v26 }
 0x113   :  { %v120_v29 = vmul.f32 %v109_v28, %v86_v11 }
 0x115   :  { %v125_v31 = vmul.f32 %v2583_v27, %v120_v29 }
 0x117   :  { %v2592_v32 = vadd.f32 %v2588_v30, %v125_v31 }
 0x119   :  { %2204 = vmatmul.msk.f32.vlgmr.msra.gmra.mxu0 %vm70_vm0, %v2592_v32 }
 0x196   :  { %v168_v34 = vpop.f32.mrf.mxu0 }
 0x197   :  { %v2602_v35 = vadd.f32 %v2599_v33, %v168_v34 }
 0x199   :  { %242 = vrot.lane.b32.xlu2 %v2602_v35, %s2443_s27  ;;  %175 = vrot.lane.b32.xlu1 %v2602_v35, %s2444_s28 }
 0x1a1   :  { %244 = vrot.lane.b32.xlu1 %v2602_v35, %s2445_s4 }
 0x1f3   :  { %v243_v38 = vpop.permute.xlu2 %242 }
 0x20b   :  { %v176_v36 = vpop.permute.xlu1 %175 }
 0x20c   :  { %2206 = vmatpush.xpose.msk.msra.mxu1 %vm177_vm5, %v176_v36 }
 0x20f   :  { %2207 = vmatmul.msk.f32.vlgmr.msra.gmra.mxu1 %vm177_vm5, %v2602_v35 }
 0x210   :  { %327 = vmatpush.msrb.mxu1 %v2656_v14 }
 0x213   :  { %v245_v37 = vpop.permute.xlu1 %244 }
 0x214   :  { %2209 = vmatpush.xpose.msk.msra.mxu3 %vm177_vm5, %v245_v37 }
 0x217   :  { %2210 = vmatmul.msk.f32.vlgmr.msra.gmra.mxu3 %vm177_vm5, %v243_v38 }
 0x218   :  { %350 = vmatpush.msrb.mxu3 %v2650_v13 }
 0x28c   :  { %v199_v41 = vpop.f32.mrf.mxu1 }
 0x28d   :  { %v202_v42 = vmul.f32 0.35355338, %v199_v41 }
 0x28f   :  { %v204_v43 = vadd.f32 %v2621_v40, %v202_v42 }
 0x291   :  { %v205_v44 = vsel %vm177_vm5, %v204_v43, -inf }
 0x292   :  { %206 = vmax.xlane.f32.xlu2 %v205_v44 }
 0x29a   :  { %v267_v45 = vpop.f32.mrf.mxu3 }
 0x29b   :  { %v270_v46 = vmul.f32 0.35355338, %v267_v45 }
 0x29d   :  { %v271_v47 = vadd.f32 %v270_v46, %v2621_v40  ;;  %v139_v46 = vld [vmem:[%s3226_s6 + $0x10] sm:$0xff] }
 0x29e   :  { %440 = vmatpush.msra.mxu3 %v139_v46 }
 0x29f   :  { %v272_v48 = vsel %vm177_vm5, %v271_v47, -inf }
 0x2a0   :  { %273 = vmax.xlane.f32.xlu0 %v272_v48 }
 0x2aa   :  { %283 = vrot.lane.b32.xlu2 %v2602_v35, %s2446_s0 }
 0x2b4   :  { %216 = vrot.lane.b32.xlu0 %v2602_v35, %s3246_s1 }
 0x305   :  { %v207_v49 = vpop.xlane.xlu2 %206 }
 0x306   :  { %v208_v50 = vsub.f32 %v204_v43, %v207_v49 }
 0x308   :  { %v209_v51 = vmul.f32 1.442695, %v208_v50 }
 0x30a   :  { %2352 = vpow2.f32 %v209_v51 }
 0x30d   :  { %v284_v60 = vpop.permute.xlu2 %283 }
 0x310   :  { %v2353_v52 = vpop.eup %2352 }
 0x311   :  { %v211_v53 = vsel %vm177_vm5, %v2353_v52, 0.0 }
 0x312   :  { %212 = vadd.xlane.f32.xlu1 %v211_v53 }
 0x313   :  { %v274_v54 = vpop.xlane.xlu0 %273 }
 0x314   :  { %v275_v55 = vsub.f32 %v271_v47, %v274_v54 }
 0x316   :  { %v276_v56 = vmul.f32 1.442695, %v275_v55 }
 0x318   :  { %2354 = vpow2.f32 %v276_v56 }
 0x31e   :  { %v2355_v57 = vpop.eup %2354 }
 0x31f   :  { %v278_v58 = vsel %vm177_vm5, %v2355_v57, 0.0 }
 0x320   :  { %279 = vadd.xlane.f32.xlu0 %v278_v58 }
 0x326   :  { %v217_v59 = vpop.permute.xlu0 %216 }
 0x327   :  { %237 = vmatpush.msra.mxu2 %v217_v59 }
 0x329   :  { %304 = vmatpush.msrb.mxu2 %v284_v60 }
 0x32b   :  { %355 = vrot.lane.b32.xlu1 %v2602_v35, %s3254_s21 }
 0x334   :  { %357 = vrot.lane.b32.xlu0 %v2602_v35, %s3256_s2 }
 0x35e   :  { %75 = vadd.xlane.f32.xlu0 %v74_v62  ;;  %v2707_v62 = vperm.slane %v2618_v39, 1 }
 0x385   :  { %v213_v63 = vpop.xlane.xlu1 %212 }
 0x386   :  { %2356 = vrcp.f32 %v213_v63 }
 0x38c   :  { %v2357_v0 = vpop.eup %2356 }
 0x38d   :  { %v215_v1 = vmul.f32 %v2357_v0, %v2353_v52 }
 0x38f   :  { %2208 = vmatmul.msk.f32.vlgmr.msra.gmra.mxu2 %vm177_vm5, %v215_v1 }
 0x393   :  { %v280_v2 = vpop.xlane.xlu0 %279 }
 0x394   :  { %2358 = vrcp.f32 %v280_v2 }
 0x39a   :  { %v2359_v3 = vpop.eup %2358 }
 0x39b   :  { %v282_v4 = vmul.f32 %v2359_v3, %v2355_v57 }
 0x39d   :  { %2211 = vmatmul.msk.f32.vlgmr.msrb.gmra.mxu2 %vm177_vm5, %v282_v4  ;;  %v356_v6 = vpop.permute.xlu1 %355 }
 0x3a6   :  { %v358_v5 = vpop.permute.xlu0 %357 }
 0x3a7   :  { %2214 = vmatpush.xpose.msk.msra.mxu2 %vm177_vm5, %v358_v5 }
 0x3aa   :  { %2215 = vmatmul.msk.f32.vlgmr.msra.gmra.mxu2 %vm177_vm5, %v356_v6 }
 0x3d1   :  { %v76_v7 = vpop.xlane.xlu0 %75 }
 0x3d2   :  { %v85_v9 = vmul.f32 %v2563_v8, %v76_v7 }
 0x3d4   :  { %v87_v10 = vsub.f32 %v67_v61, %v85_v9 }
 0x3d6   :  { %v89_v11 = vmul.f32 %v87_v10, %v87_v10 }
 0x3d8   :  { %v93_v12 = vsel %vm70_vm0, %v89_v11, 0.0 }
 0x3d9   :  { %94 = vadd.xlane.f32.xlu2 %v93_v12 }
 0x412   :  { %v239_v15 = vpop.f32.mrf.mxu2 }
 0x413   :  { %2213 = vmatmul.msk.f32.vlgmr.msrb.gmra.mxu3 %vm177_vm5, %v239_v15 }
 0x420   :  { %v306_v16 = vpop.f32.mrf.mxu2 }
 0x421   :  { %2212 = vmatmul.msk.f32.vlgmr.msrb.gmra.mxu1 %vm177_vm5, %v306_v16 }
 0x42d   :  { %v380_v17 = vpop.f32.mrf.mxu2 }
 0x42e   :  { %v383_v18 = vmul.f32 0.35355338, %v380_v17 }
 0x430   :  { %v384_v19 = vadd.f32 %v383_v18, %v2621_v40 }
 0x432   :  { %v385_v20 = vsel %vm177_vm5, %v384_v19, -inf }
 0x433   :  { %386 = vmax.xlane.f32.xlu1 %v385_v20 }
 0x44c   :  { %v95_v21 = vpop.xlane.xlu2 %94  ;;  %448 = vrot.lane.b32.xlu1 %v2602_v35, %s3252_s30 }
 0x44d   :  { %v97_v22 = vmul.f32 %v95_v21, %v2563_v8 }
 0x44f   :  { %v99_v23 = vadd.f32 1e-05, %v97_v22 }
 0x451   :  { %2360 = vrsqrt.f32 %v99_v23  ;;  %vm116_vm6 = vweird.f32 %v99_v23 }
 0x457   :  { %v2361_v24 = vpop.eup %2360 }
 0x458   :  { %v111_v25 = vmul.f32 %v2361_v24, %v99_v23  ;;  %vm117_vm7 = vweird.f32 %v2361_v24 }
 0x459   :  { %vm118_vm8 = vmor %vm116_vm6, %vm117_vm7 }
 0x45a   :  { %v112_v26 = vmul.f32 %v2361_v24, %v111_v25 }
 0x45c   :  { %v113_v28 = vmul.f32 0.5, %v112_v26 }
 0x45e   :  { %v114_v29 = vsub.f32 1.5, %v113_v28 }
 0x460   :  { %v115_v31 = vmul.f32 %v2361_v24, %v114_v29 }
 0x462   :  { %v119_v34 = vsel %vm118_vm8, %v2361_v24, %v115_v31  ;;  %v2735_v24 = vld [vmem:[%s3226_s6 + $0x18] sm:$0xff] }
 0x463   :  { %v121_v36 = vmul.f32 %v119_v34, %v87_v10 }
 0x465   :  { %v126_v37 = vmul.f32 %v2583_v27, %v121_v36 }
 0x467   :  { %v2668_v38 = vadd.f32 %v2588_v30, %v126_v37 }
 0x469   :  { %2205 = vmatmul.msk.f32.gmra.mxu0 %vm70_vm0, %v2668_v38 }
 0x496   :  { %v2702_v60 = vpop.f32.mrf.mxu3 }
 0x49e   :  { %v2692_v54 = vpop.f32.mrf.mxu1 }
 0x4a6   :  { %v387_v41 = vpop.xlane.xlu1 %386 }
 0x4a7   :  { %v388_v42 = vsub.f32 %v384_v19, %v387_v41 }
 0x4a9   :  { %v389_v43 = vmul.f32 1.442695, %v388_v42 }
 0x4ab   :  { %2362 = vpow2.f32 %v389_v43 }
 0x4b1   :  { %v2363_v44 = vpop.eup %2362 }
 0x4b2   :  { %v391_v45 = vsel %vm177_vm5, %v2363_v44, 0.0 }
 0x4b3   :  { %392 = vadd.xlane.f32.xlu0 %v391_v45 }
 0x4be   :  { %v449_v51 = vpop.permute.xlu1 %448 }
 0x4c7   :  { %396 = vrot.lane.b32.xlu0 %v2602_v35, %s3244_s22 }
 0x4cf   :  { %446 = vrot.lane.b32.xlu0 %v2602_v35, %s3250_s24 }
 0x4e6   :  { %v171_v27 = vpop.f32.mrf.mxu0 }
 0x4e7   :  { %v2678_v30 = vadd.f32 %v2599_v33, %v171_v27 }
 0x4e9   :  { %539 = vrot.lane.b32.xlu2 %v2678_v30, %s2444_s28  ;;  %579 = vrot.lane.b32.xlu1 %v2678_v30, %s3246_s1 }
 0x526   :  { %v393_v47 = vpop.xlane.xlu0 %392 }
 0x527   :  { %2364 = vrcp.f32 %v393_v47 }
 0x52d   :  { %v2365_v48 = vpop.eup %2364 }
 0x52e   :  { %v395_v49 = vmul.f32 %v2365_v48, %v2363_v44 }
 0x539   :  { %v397_v50 = vpop.permute.xlu0 %396 }
 0x53a   :  { %417 = vmatpush.msra.mxu1 %v397_v50 }
 0x53b   :  { %2216 = vmatmul.msk.f32.vlgmr.msra.gmra.mxu1 %vm177_vm5, %v395_v49 }
 0x53c   :  { %2218 = vmatpush.xpose.msk.msrb.mxu1 %vm177_vm5, %v449_v51 }
 0x540   :  { %531 = vmatpush.msra.mxu1 %v2735_v24 }
 0x541   :  { %v447_v33 = vpop.permute.xlu0 %446 }
 0x543   :  { %v540_v52 = vpop.permute.xlu2 %539  ;;  %2219 = vmatmul.msk.f32.vlgmr.msrb.gmra.mxu1 %vm177_vm5, %v447_v33 }
 0x544   :  { %2222 = vmatpush.xpose.msk.msrb.mxu3 %vm177_vm5, %v540_v52 }
 0x55b   :  { %v580_v53 = vpop.permute.xlu1 %579 }
 0x55c   :  { %600 = vmatpush.msrb.mxu0 %v580_v53 }
 0x55e   :  { %713 = vmatpush.msra.mxu0 %v2650_v13 }
 0x5b8   :  { %v419_v55 = vpop.f32.mrf.mxu1 }
 0x5b9   :  { %2217 = vmatmul.msk.f32.vlgmr.msra.gmra.mxu3 %vm177_vm5, %v419_v55 }
 0x5ba   :  { %690 = vmatpush.msra.mxu3 %v2656_v14 }
 0x5c0   :  { %v471_v56 = vpop.f32.mrf.mxu1 }
 0x5c1   :  { %v474_v57 = vmul.f32 0.35355338, %v471_v56  ;;  %2223 = vmatmul.msk.f32.vlgmr.msrb.gmra.mxu3 %vm177_vm5, %v2678_v30 }
 0x5c2   :  { %803 = vmatpush.msrb.mxu3 %v139_v46  ;;  %v353_v46 = vadd.f32 %v2702_v60, %v2692_v54 }
 0x5c3   :  { %v475_v58 = vadd.f32 %v474_v57, %v2621_v40 }
 0x5c5   :  { %v476_v59 = vsel %vm177_vm5, %v475_v58, -inf }
 0x5c6   :  { %477 = vmax.xlane.f32.xlu1 %v476_v59 }
 0x5df   :  { %720 = vrot.lane.b32.xlu1 %v2678_v30, %s3256_s2  ;;  %s3268_s2 = smov 80  }
 0x639   :  { %v478_v39 = vpop.xlane.xlu1 %477 }
 0x63a   :  { %v479_v5 = vsub.f32 %v475_v58, %v478_v39 }
 0x63c   :  { %v2704_v61 = vpop.f32.mrf.mxu3  ;;  %v480_v7 = vmul.f32 1.442695, %v479_v5 }
 0x63d   :  { %v445_v48 = vadd.f32 %v2704_v61, %v353_v46  ;;  %v2762_v61 = vld [vmem:[%s3227_s7] ss:$0 sm:$0xff] }
 0x644   :  { %v562_v63 = vpop.f32.mrf.mxu3 }
 0x645   :  { %v565_v0 = vmul.f32 0.35355338, %v562_v63 }
 0x647   :  { %v567_v1 = vadd.f32 %v2707_v62, %v565_v0 }
 0x649   :  { %v568_v2 = vsel %vm177_vm5, %v567_v1, -inf }
 0x64a   :  { %569 = vmax.xlane.f32.xlu0 %v568_v2 }
 0x651   :  { %v721_v20 = vpop.permute.xlu1 %720 }
 0x65e   :  { %487 = vrot.lane.b32.xlu0 %v2602_v35, %s3248_s5 }
 0x666   :  { %605 = vrot.lane.b32.xlu0 %v2678_v30, %s2443_s27 }
 0x66e   :  { %718 = vrot.lane.b32.xlu0 %v2678_v30, %s3254_s21 }
 0x676   :  { %809 = vrot.lane.b32.xlu0 %v2678_v30, %s3250_s24 }
 0x6bd   :  { %v570_v3 = vpop.xlane.xlu0 %569 }
 0x6be   :  { %v571_v4 = vsub.f32 %v567_v1, %v570_v3 }
 0x6c0   :  { %v572_v6 = vmul.f32 1.442695, %v571_v4 }
 0x6c2   :  { %2366 = vpow2.f32 %v572_v6 }
 0x6c3   :  { %2368 = vpow2.f32 %v480_v7 }
 0x6c8   :  { %v2367_v9 = vpop.eup %2366 }
 0x6c9   :  { %v574_v35 = vsel %vm177_vm5, %v2367_v9, 0.0  ;;  %v2369_v10 = vpop.eup %2368 }
 0x6ca   :  { %575 = vadd.xlane.f32.xlu2 %v574_v35  ;;  %v482_v12 = vsel %vm177_vm5, %v2369_v10, 0.0 }
 0x6d0   :  { %v488_v11 = vpop.permute.xlu0 %487 }
 0x6d1   :  { %508 = vmatpush.msrb.mxu2 %v488_v11 }
 0x6d2   :  { %483 = vadd.xlane.f32.xlu2 %v482_v12 }
 0x6d8   :  { %v606_v21 = vpop.permute.xlu0 %605 }
 0x6e0   :  { %v719_v23 = vpop.permute.xlu0 %718 }
 0x6e8   :  { %v810_v26 = vpop.permute.xlu0 %809 }
 0x6ea   :  { %607 = vrot.lane.b32.xlu2 %v2678_v30, %s2445_s4 }
 0x6f2   :  { %811 = vrot.lane.b32.xlu2 %v2678_v30, %s3252_s30 }
 0x73d   :  { %v576_v13 = vpop.xlane.xlu2 %575 }
 0x73e   :  { %2370 = vrcp.f32 %v576_v13 }
 0x744   :  { %v2371_v14 = vpop.eup %2370 }
 0x745   :  { %v484_v15 = vpop.xlane.xlu2 %483  ;;  %v578_v16 = vmul.f32 %v2371_v14, %v2367_v9 }
 0x746   :  { %2372 = vrcp.f32 %v484_v15 }
 0x747   :  { %2224 = vmatmul.msk.f32.vlgmr.msrb.gmra.mxu0 %vm177_vm5, %v578_v16 }
 0x74c   :  { %v2373_v17 = vpop.eup %2372 }
 0x74d   :  { %v486_v18 = vmul.f32 %v2373_v17, %v2369_v10  ;;  %v608_v19 = vpop.permute.xlu2 %607 }
 0x74e   :  { %2225 = vmatpush.xpose.msk.msra.mxu2 %vm177_vm5, %v608_v19 }
 0x74f   :  { %2220 = vmatmul.msk.f32.vlgmr.msrb.gmra.mxu2 %vm177_vm5, %v486_v18 }
 0x752   :  { %2230 = vmatpush.xpose.msk.msrb.mxu2 %vm177_vm5, %v721_v20 }
 0x755   :  { %v812_v22 = vpop.permute.xlu2 %811 }
 0x756   :  { %2234 = vmatpush.xpose.msk.msrb.mxu0 %vm177_vm5, %v812_v22 }
 0x757   :  { %2226 = vmatmul.msk.f32.vlgmr.msra.gmra.mxu2 %vm177_vm5, %v606_v21 }
 0x75f   :  { %2231 = vmatmul.msk.f32.vlgmr.msrb.gmra.mxu2 %vm177_vm5, %v719_v23 }
 0x7c4   :  { %v602_v25 = vpop.f32.mrf.mxu0 }
 0x7c5   :  { %2229 = vmatmul.msk.f32.vlgmr.msra.gmra.mxu0 %vm177_vm5, %v602_v25  ;;  %v968_v25 = vld [vmem:[%s3231_s10 + $0x10] sm:$0xff] }
 0x7cd   :  { %2235 = vmatmul.msk.f32.vlgmr.msrb.gmra.mxu0 %vm177_vm5, %v810_v26  ;;  %v967_v26 = vld [vmem:[%s3231_s10 + $0x8] sm:$0xff] }
 0x7d2   :  { %v510_v28 = vpop.f32.mrf.mxu2 }
 0x7d3   :  { %2221 = vmatmul.msk.f32.vlgmr.msra.gmra.mxu1 %vm177_vm5, %v510_v28  ;;  %v966_v28 = vld [vmem:[%s3231_s10] sm:$0xff] }
 0x7da   :  { %v630_v29 = vpop.f32.mrf.mxu2 }
 0x7db   :  { %v633_v31 = vmul.f32 0.35355338, %v630_v29 }
 0x7dd   :  { %v634_v34 = vadd.f32 %v633_v31, %v2707_v62 }
 0x7df   :  { %v635_v36 = vsel %vm177_vm5, %v634_v34, -inf }
 0x7e0   :  { %636 = vmax.xlane.f32.xlu2 %v635_v36 }
 0x7e2   :  { %v743_v37 = vpop.f32.mrf.mxu2 }
 0x7e3   :  { %v746_v41 = vmul.f32 0.35355338, %v743_v37 }
 0x7e5   :  { %v747_v42 = vadd.f32 %v746_v41, %v2707_v62 }
 0x7e7   :  { %v748_v43 = vsel %vm177_vm5, %v747_v42, -inf }
 0x7e8   :  { %749 = vmax.xlane.f32.xlu0 %v748_v43 }
 0x842   :  { %v2745_v44 = vpop.f32.mrf.mxu0 }
 0x84a   :  { %v834_v45 = vpop.f32.mrf.mxu0 }
 0x84b   :  { %v837_v27 = vmul.f32 0.35355338, %v834_v45 }
 0x84d   :  { %v838_v47 = vadd.f32 %v837_v27, %v2707_v62  ;;  %v2794_v27 = vld [vmem:[%s3228_s8] ss:$0 sm:$0xff] }
 0x84f   :  { %v839_v49 = vsel %vm177_vm5, %v838_v47, -inf }
 0x850   :  { %v533_v50 = vpop.f32.mrf.mxu1  ;;  %840 = vmax.xlane.f32.xlu1 %v839_v49 }
 0x851   :  { %v536_v51 = vadd.f32 %v533_v50, %v445_v48  ;;  %v2799_v48 = vld [vmem:[%s3229_s9] ss:$0 sm:$0xff] }
 0x853   :  { %537 = vst.msk [vmem:[#allocation2] sm:$0xff] %vm70_vm0, %v536_v51  ;;  %v637_v33 = vpop.xlane.xlu2 %636 }
 0x854   :  { %v638_v52 = vsub.f32 %v634_v34, %v637_v33  ;;  %v1036_v33 = vld [vmem:[%s3232_s12 + $0x78] sm:$0xff] }
 0x855   :  { %1041 = vmatpush.msra.mxu0 %v1036_v33 }
 0x856   :  { %v639_v53 = vmul.f32 1.442695, %v638_v52  ;;  %v1035_v52 = vld [vmem:[%s3232_s12 + $0x70] sm:$0xff] }
 0x857   :  { %1042 = vmatpush.msra.mxu0 %v1035_v52 }
 0x858   :  { %2374 = vpow2.f32 %v639_v53  ;;  %v1034_v53 = vld [vmem:[%s3232_s12 + $0x68] sm:$0xff] }
 0x859   :  { %1043 = vmatpush.msra.mxu0 %v1034_v53 }
 0x85a   :  { %v901_v63 = vld [vmem:[#allocation2] sm:$0xff] }
 0x85b   :  { %v750_v55 = vpop.xlane.xlu0 %749  ;;  %v906_v0 = vadd.f32 %v2762_v61, %v901_v63  ;;  %v1026_v63 = vld [vmem:[%s3232_s12 + $0x28] sm:$0xff] }
 0x85c   :  { %v751_v56 = vsub.f32 %v747_v42, %v750_v55  ;;  %v1033_v55 = vld [vmem:[%s3232_s12 + $0x60] sm:$0xff] }
 0x85d   :  { %v908_v1 = vadd.f32 %v906_v0, %v2592_v32  ;;  %1044 = vmatpush.msra.mxu0 %v1033_v55  ;;  %v1025_v0 = vld [vmem:[%s3232_s12 + $0x20] sm:$0xff] }
 0x85e   :  { %v2375_v57 = vpop.eup %2374  ;;  %v752_v58 = vmul.f32 1.442695, %v751_v56  ;;  %v1032_v56 = vld [vmem:[%s3232_s12 + $0x58] sm:$0xff] }
 0x85f   :  { %v641_v54 = vsel %vm177_vm5, %v2375_v57, 0.0  ;;  %v912_v2 = vsel %vm70_vm0, %v908_v1, 0.0  ;;  %1045 = vmatpush.msra.mxu0 %v1032_v56 }
 0x860   :  { %2376 = vpow2.f32 %v752_v58  ;;  %642 = vadd.xlane.f32.xlu2 %v641_v54  ;;  %v1030_v58 = vld [vmem:[%s3232_s12 + $0x48] sm:$0xff]  ;;  %v1029_v54 = vld [vmem:[%s3232_s12 + $0x40] sm:$0xff] }
 0x866   :  { %v2377_v59 = vpop.eup %2376 }
 0x867   :  { %v754_v60 = vsel %vm177_vm5, %v2377_v59, 0.0 }
 0x868   :  { %755 = vadd.xlane.f32.xlu0 %v754_v60  ;;  %v1027_v60 = vld [vmem:[%s3232_s12 + $0x30] sm:$0xff] }
 0x869   :  { %646 = vrot.lane.b32.xlu1 %v2678_v30, %s2446_s0 }
 0x87c   :  { %759 = vrot.lane.b32.xlu0 %v2678_v30, %s3244_s22 }
 0x893   :  { %913 = vadd.xlane.f32.xlu1 %v912_v2  ;;  %v1024_v2 = vld [vmem:[%s3232_s12 + $0x18] sm:$0xff] }
 0x8c3   :  { %v841_v39 = vpop.xlane.xlu1 %840 }
 0x8c4   :  { %v842_v3 = vsub.f32 %v838_v47, %v841_v39  ;;  %v1023_v39 = vld [vmem:[%s3232_s12 + $0x10] sm:$0xff] }
 0x8c6   :  { %v843_v4 = vmul.f32 1.442695, %v842_v3  ;;  %v1022_v3 = vld [vmem:[%s3232_s12 + $0x8] sm:$0xff] }
 0x8c8   :  { %2378 = vpow2.f32 %v843_v4  ;;  %v1021_v4 = vld [vmem:[%s3232_s12] sm:$0xff] }
 0x8ce   :  { %v2379_v5 = vpop.eup %2378 }
 0x8cf   :  { %v845_v6 = vsel %vm177_vm5, %v2379_v5, 0.0 }
 0x8d0   :  { %846 = vadd.xlane.f32.xlu2 %v845_v6  ;;  %v2859_v6 = vld [vmem:[%s3230_s11] ss:$0 sm:$0xff] }
 0x8d3   :  { %v643_v7 = vpop.xlane.xlu2 %642 }
 0x8d4   :  { %2380 = vrcp.f32 %v643_v7 }
 0x8da   :  { %v2381_v9 = vpop.eup %2380 }
 0x8db   :  { %v645_v35 = vmul.f32 %v2381_v9, %v2375_v57  ;;  %v647_v10 = vpop.permute.xlu1 %646  ;;  %v756_v32 = vpop.xlane.xlu0 %755  ;;  %v1031_v57 = vld [vmem:[%s3232_s12 + $0x50] sm:$0xff] }
 0x8dc   :  { %667 = vmatpush.msrb.mxu1 %v647_v10  ;;  %2382 = vrcp.f32 %v756_v32  ;;  %1046 = vmatpush.msra.mxu0 %v1031_v57 }
 0x8dd   :  { %2227 = vmatmul.msk.f32.vlgmr.msrb.gmra.mxu1 %vm177_vm5, %v645_v35 }
 0x8de   :  { %1047 = vmatpush.msra.mxu0 %v1030_v58 }
 0x8e0   :  { %1048 = vmatpush.msra.mxu0 %v1029_v54 }
 0x8e2   :  { %v2383_v11 = vpop.eup %2382 }
 0x8e3   :  { %v758_v12 = vmul.f32 %v2383_v11, %v2377_v59  ;;  %v1028_v59 = vld [vmem:[%s3232_s12 + $0x38] sm:$0xff] }
 0x8e4   :  { %1049 = vmatpush.msra.mxu0 %v1028_v59 }
 0x8e6   :  { %1050 = vmatpush.msra.mxu0 %v1027_v60 }
 0x8e8   :  { %850 = vrot.lane.b32.xlu2 %v2678_v30, %s3248_s5  ;;  %1051 = vmatpush.msra.mxu0 %v1026_v63  ;;  %v2243_v63 = vld [vmem:[%s3264_s25 + $0x38] sm:$0xff]  ;;  %s3270_s5 = smov 72  }
 0x8ea   :  { %1052 = vmatpush.msra.mxu0 %v1025_v0  ;;  %v2242_v0 = vld [vmem:[%s3264_s25 + $0x30] sm:$0xff] }
 0x8ec   :  { %1053 = vmatpush.msra.mxu0 %v1024_v2 }
 0x8ee   :  { %v760_v13 = vpop.permute.xlu0 %759  ;;  %1054 = vmatpush.msra.mxu0 %v1023_v39 }
 0x8ef   :  { %780 = vmatpush.msra.mxu1 %v760_v13 }
 0x8f0   :  { %2232 = vmatmul.msk.f32.vlgmr.msra.gmra.mxu1 %vm177_vm5, %v758_v12  ;;  %1055 = vmatpush.msra.mxu0 %v1022_v3 }
 0x8f1   :  { %894 = vmatpush.msrb.mxu1 %v2735_v24  ;;  %v969_v24 = vld [vmem:[%s3231_s10 + $0x18] sm:$0xff] }
 0x8f2   :  { %1056 = vmatpush.msra.mxu0 %v1021_v4 }
 0x8f4   :  { %1157 = vmatpush.msrb.mxu0 %v2243_v63 }
 0x8f6   :  { %1158 = vmatpush.msrb.mxu0 %v2242_v0 }
 0x906   :  { %v914_v14 = vpop.xlane.xlu1 %913 }
 0x907   :  { %v918_v15 = vmul.f32 %v914_v14, %v2563_v8 }
 0x909   :  { %v920_v16 = vsub.f32 %v908_v1, %v918_v15 }
 0x90b   :  { %v922_v17 = vmul.f32 %v920_v16, %v920_v16 }
 0x90d   :  { %v924_v18 = vsel %vm70_vm0, %v922_v17, 0.0 }
 0x90e   :  { %925 = vadd.xlane.f32.xlu0 %v924_v18 }
 0x943   :  { %v847_v19 = vpop.xlane.xlu2 %846 }
 0x944   :  { %2384 = vrcp.f32 %v847_v19 }
 0x94a   :  { %v2385_v20 = vpop.eup %2384 }
 0x94b   :  { %v849_v30 = vmul.f32 %v2385_v20, %v2379_v5  ;;  %v851_v21 = vpop.permute.xlu2 %850 }
 0x94c   :  { %871 = vmatpush.msra.mxu2 %v851_v21 }
 0x94d   :  { %2236 = vmatmul.msk.f32.vlgmr.msra.gmra.mxu2 %vm177_vm5, %v849_v30 }
 0x95a   :  { %v669_v22 = vpop.f32.mrf.mxu1 }
 0x95b   :  { %2228 = vmatmul.msk.f32.vlgmr.msra.gmra.mxu3 %vm177_vm5, %v669_v22 }
 0x95c   :  { %992 = vmatpush.msra.mxu3 %v969_v24  ;;  %v2870_v24 = vld [vmem:[%s3233_s13] ss:$0 sm:$0xff] }
 0x95e   :  { %993 = vmatpush.msra.mxu3 %v968_v25 }
 0x960   :  { %994 = vmatpush.msra.mxu3 %v967_v26 }
 0x962   :  { %995 = vmatpush.msra.mxu3 %v966_v28 }
 0x96d   :  { %v782_v23 = vpop.f32.mrf.mxu1 }
 0x96e   :  { %2233 = vmatmul.msk.f32.vlgmr.msrb.gmra.mxu3 %vm177_vm5, %v782_v23 }
 0x981   :  { %v926_v29 = vpop.xlane.xlu0 %925 }
 0x982   :  { %v930_v31 = vmul.f32 %v926_v29, %v2563_v8 }
 0x984   :  { %v932_v34 = vadd.f32 1e-05, %v930_v31 }
 0x986   :  { %2386 = vrsqrt.f32 %v932_v34  ;;  %vm940_vm10 = vweird.f32 %v932_v34 }
 0x98c   :  { %v2387_v36 = vpop.eup %2386 }
 0x98d   :  { %v935_v37 = vmul.f32 %v2387_v36, %v932_v34  ;;  %vm941_vm9 = vweird.f32 %v2387_v36 }
 0x98e   :  { %vm942_vm11 = vmor %vm940_vm10, %vm941_vm9 }
 0x98f   :  { %v936_v41 = vmul.f32 %v2387_v36, %v935_v37 }
 0x991   :  { %v937_v42 = vmul.f32 0.5, %v936_v41 }
 0x993   :  { %v938_v43 = vsub.f32 1.5, %v937_v42 }
 0x995   :  { %v939_v45 = vmul.f32 %v2387_v36, %v938_v43 }
 0x997   :  { %v943_v46 = vsel %vm942_vm11, %v2387_v36, %v939_v45 }
 0x998   :  { %v954_v47 = vmul.f32 %v943_v46, %v920_v16 }
 0x99a   :  { %v959_v49 = vmul.f32 %v2794_v27, %v954_v47 }
 0x99c   :  { %v2803_v50 = vadd.f32 %v2799_v48, %v959_v49 }
 0x99e   :  { %2238 = vmatmul.msk.f32.vlgmr.msra.gmra.mxu3 %vm70_vm0, %v2803_v50 }
 0x9d0   :  { %v873_v51 = vpop.f32.mrf.mxu2 }
 0x9d1   :  { %2237 = vmatmul.msk.f32.vlgmr.msrb.gmra.mxu1 %vm177_vm5, %v873_v51 }
 0x9de   :  { %v692_v1 = vpop.f32.mrf.mxu3 }
 0x9df   :  { %v716_v17 = vadd.f32 %v2745_v44, %v692_v1  ;;  %v2240_v1 = vld [vmem:[%s3264_s25 + $0x20] sm:$0xff] }
 0x9f1   :  { %v805_v5 = vpop.f32.mrf.mxu3 }
 0x9f2   :  { %v808_v18 = vadd.f32 %v805_v5, %v716_v17 }
 0xa21   :  { %v997_v7 = vpop.f32.mrf.mxu3 }
 0xa22   :  { %v998_v9 = vadd.f32 %v2859_v6, %v997_v7 }
 0xa24   :  { %v1003_v35 = vmul.f32 %v998_v9, %v998_v9 }
 0xa26   :  { %v1005_v10 = vmul.f32 %v1003_v35, %v998_v9 }
 0xa28   :  { %v1007_v32 = vmul.f32 0.044715, %v1005_v10 }
 0xa2a   :  { %v1009_v11 = vadd.f32 %v1007_v32, %v998_v9 }
 0xa2c   :  { %v1011_v12 = vmul.f32 0.7978846, %v1009_v11 }
 0xa2e   :  { %2388 = vtanh.f32 %v1011_v12 }
 0xa34   :  { %v2389_v13 = vpop.eup %2388 }
 0xa35   :  { %v1015_v14 = vadd.f32 1.0, %v2389_v13 }
 0xa37   :  { %v1017_v15 = vmul.f32 0.5, %v1015_v14 }
 0xa39   :  { %v1019_v16 = vmul.f32 %v1017_v15, %v998_v9 }
 0xa3b   :  { %1057 = vmatmul.f32.vlgmr.msra.gmra.mxu0 %v1019_v16 }
 0xa4e   :  { %v896_v19 = vpop.f32.mrf.mxu1 }
 0xa4f   :  { %v899_v20 = vadd.f32 %v896_v19, %v808_v18 }
 0xa51   :  { %900 = vst.msk [vmem:[#allocation2 + $0x8] sm:$0xff] %vm70_vm0, %v899_v20  ;;  %v2337_v20 = vld [vmem:[%s3235_s15] ss:$0 sm:$0xff] }
 0xa58   :  { %v902_v30 = vld [vmem:[#allocation2 + $0x8] sm:$0xff] }
 0xa59   :  { %v907_v21 = vadd.f32 %v2762_v61, %v902_v30 }
 0xa5b   :  { %v909_v22 = vadd.f32 %v907_v21, %v2668_v38 }
 0xa5d   :  { %v915_v23 = vsel %vm70_vm0, %v909_v22, 0.0 }
 0xa5e   :  { %916 = vadd.xlane.f32.xlu2 %v915_v23 }
 0xab8   :  { %v1058_v25 = vpop.f32.mrf.mxu0 }
 0xab9   :  { %v1059_v44 = vadd.f32 %v2870_v24, %v1058_v25 }
 0xabb   :  { %v1064_v26 = vadd.f32 %v1059_v44, %v2803_v50  ;;  %v2338_v44 = vld [vmem:[%s3267_s26 + $0x1] ss:$0 sm:$0xff]  ;;  %s3269_s26 = smov 112  }
 0xabd   :  { %v1068_v28 = vsel %vm70_vm0, %v1064_v26, 0.0 }
 0xabe   :  { %1069 = vadd.xlane.f32.xlu0 %v1068_v28 }
 0xad1   :  { %v917_v29 = vpop.xlane.xlu2 %916 }
 0xad2   :  { %v919_v61 = vmul.f32 %v917_v29, %v2563_v8 }
 0xad4   :  { %v921_v38 = vsub.f32 %v909_v22, %v919_v61 }
 0xad6   :  { %v923_v31 = vmul.f32 %v921_v38, %v921_v38 }
 0xad8   :  { %v927_v34 = vsel %vm70_vm0, %v923_v31, 0.0 }
 0xad9   :  { %928 = vadd.xlane.f32.xlu1 %v927_v34 }
 0xb31   :  { %v1070_v36 = vpop.xlane.xlu0 %1069 }
 0xb32   :  { %v1074_v37 = vmul.f32 %v1070_v36, %v2563_v8 }
 0xb34   :  { %v1076_v41 = vsub.f32 %v1064_v26, %v1074_v37 }
 0xb36   :  { %v1078_v42 = vmul.f32 %v1076_v41, %v1076_v41 }
 0xb38   :  { %v1080_v43 = vsel %vm70_vm0, %v1078_v42, 0.0 }
 0xb39   :  { %1081 = vadd.xlane.f32.xlu2 %v1080_v43 }
 0xb4c   :  { %v929_v45 = vpop.xlane.xlu1 %928 }
 0xb4d   :  { %v931_v46 = vmul.f32 %v929_v45, %v2563_v8 }
 0xb4f   :  { %v933_v47 = vadd.f32 1e-05, %v931_v46 }
 0xb51   :  { %2390 = vrsqrt.f32 %v933_v47  ;;  %vm950_vm13 = vweird.f32 %v933_v47 }
 0xb57   :  { %v2391_v49 = vpop.eup %2390 }
 0xb58   :  { %v945_v50 = vmul.f32 %v2391_v49, %v933_v47  ;;  %vm951_vm12 = vweird.f32 %v2391_v49 }
 0xb59   :  { %vm952_vm14 = vmor %vm950_vm13, %vm951_vm12 }
 0xb5a   :  { %v946_v51 = vmul.f32 %v2391_v49, %v945_v50 }
 0xb5c   :  { %v947_v33 = vmul.f32 0.5, %v946_v51 }
 0xb5e   :  { %v948_v52 = vsub.f32 1.5, %v947_v33 }
 0xb60   :  { %v949_v53 = vmul.f32 %v2391_v49, %v948_v52 }
 0xb62   :  { %v953_v55 = vsel %vm952_vm14, %v2391_v49, %v949_v53 }
 0xb63   :  { %v955_v56 = vmul.f32 %v953_v55, %v921_v38 }
 0xb65   :  { %v960_v57 = vmul.f32 %v2794_v27, %v955_v56  ;;  %v2241_v27 = vld [vmem:[%s3264_s25 + $0x28] sm:$0xff] }
 0xb66   :  { %1159 = vmatpush.msrb.mxu0 %v2241_v27 }
 0xb67   :  { %v965_v58 = vadd.f32 %v2799_v48, %v960_v57 }
 0xb68   :  { %1160 = vmatpush.msrb.mxu0 %v2240_v1 }
 0xb69   :  { %2239 = vmatmul.msk.f32.gmra.mxu3 %vm70_vm0, %v965_v58 }
 0xbac   :  { %v1082_v54 = vpop.xlane.xlu2 %1081 }
 0xbad   :  { %v1086_v59 = vmul.f32 %v1082_v54, %v2563_v8 }
 0xbaf   :  { %v1088_v60 = vadd.f32 1e-05, %v1086_v59 }
 0xbb1   :  { %2392 = vrsqrt.f32 %v1088_v60  ;;  %vm1096_vm1 = vweird.f32 %v1088_v60 }
 0xbb7   :  { %v2393_v48 = vpop.eup %2392 }
 0xbb8   :  { %v1091_v39 = vmul.f32 %v2393_v48, %v1088_v60  ;;  %vm1097_vm15 = vweird.f32 %v2393_v48 }
 0xbb9   :  { %vm1098_vm2 = vmor %vm1096_vm1, %vm1097_vm15  ;;  %vm2197_vm15 = vcmask 130048  }
 0xbba   :  { %v1092_v5 = vmul.f32 %v2393_v48, %v1091_v39 }
 0xbbc   :  { %v1093_v35 = vmul.f32 0.5, %v1092_v5 }
 0xbbe   :  { %v1094_v11 = vsub.f32 1.5, %v1093_v35 }
 0xbc0   :  { %v1095_v12 = vmul.f32 %v2393_v48, %v1094_v11 }
 0xbc2   :  { %v1099_v15 = vsel %vm1098_vm2, %v2393_v48, %v1095_v12 }
 0xbc3   :  { %v1110_v17 = vmul.f32 %v1099_v15, %v1076_v41 }
 0xbec   :  { %v1000_v2 = vpop.f32.mrf.mxu3 }
 0xbed   :  { %v1001_v3 = vadd.f32 %v2859_v6, %v1000_v2  ;;  %v2336_v6 = vld [vmem:[%s3234_s14] ss:$0 sm:$0xff] }
 0xbee   :  { %v1115_v19 = vmul.f32 %v2336_v6, %v1110_v17 }
 0xbef   :  { %v1004_v4 = vmul.f32 %v1001_v3, %v1001_v3 }
 0xbf0   :  { %v2903_v30 = vadd.f32 %v2337_v20, %v1115_v19 }
 0xbf1   :  { %v1006_v7 = vmul.f32 %v1004_v4, %v1001_v3 }
 0xbf3   :  { %v1008_v9 = vmul.f32 0.044715, %v1006_v7 }
 0xbf5   :  { %v1010_v10 = vadd.f32 %v1008_v9, %v1001_v3 }
 0xbf7   :  { %v1012_v32 = vmul.f32 0.7978846, %v1010_v10 }
 0xbf9   :  { %2394 = vtanh.f32 %v1012_v32 }
 0xbff   :  { %v2395_v13 = vpop.eup %2394 }
 0xc00   :  { %v1016_v14 = vadd.f32 1.0, %v2395_v13 }
 0xc02   :  { %v1018_v16 = vmul.f32 0.5, %v1016_v14 }
 0xc04   :  { %v1020_v18 = vmul.f32 %v1018_v16, %v1001_v3 }
 0xc06   :  { %1060 = vmatmul.f32.gmra.mxu0 %v1020_v18 }
 0xc0e   :  { %2250 = vmatmul.msk.f32.vlgmr.msrb.gmra.mxu0 %vm70_vm0, %v2903_v30 }
 0xc83   :  { %v1061_v21 = vpop.f32.mrf.mxu0 }
 0xc84   :  { %v1062_v22 = vadd.f32 %v2870_v24, %v1061_v21 }
 0xc86   :  { %v1065_v23 = vadd.f32 %v1062_v22, %v965_v58 }
 0xc88   :  { %v1071_v25 = vsel %vm70_vm0, %v1065_v23, 0.0 }
 0xc89   :  { %1072 = vadd.xlane.f32.xlu1 %v1071_v25 }
 0xc8b   :  { %v1162_v26 = vpop.f32.mrf.mxu0 }
 0xc8c   :  { %v2912_v28 = vadd.f32 %v2338_v44, %v1162_v26 }
 0xc8e   :  { %1236 = vrot.lane.b32.xlu2 %v2912_v28, %s2445_s4 }
 0xca2   :  { %1234 = vrot.lane.b32.xlu1 %v2912_v28, %s2443_s27 }
 0xcaa   :  { %1169 = vrot.lane.b32.xlu1 %v2912_v28, %s2444_s28 }
 0xcb2   :  { %1275 = vrot.lane.b32.xlu1 %v2912_v28, %s2446_s0 }
 0xcba   :  { %1349 = vrot.lane.b32.xlu1 %v2912_v28, %s3268_s2 }
 0xcc2   :  { %1347 = vrot.lane.b32.xlu1 %v2912_v28, %s3269_s26 }
 0xcca   :  { %1440 = vrot.lane.b32.xlu1 %v2912_v28, %s3270_s5 }
 0xce8   :  { %v1237_v24 = vpop.permute.xlu2 %1236 }
 0xce9   :  { %2255 = vmatpush.xpose.msk.msrb.mxu3 %vm177_vm5, %v1237_v24 }
 0xcfc   :  { %v1073_v29 = vpop.xlane.xlu1 %1072 }
 0xcfd   :  { %v1075_v61 = vmul.f32 %v1073_v29, %v2563_v8 }
 0xcff   :  { %v1077_v38 = vsub.f32 %v1065_v23, %v1075_v61 }
 0xd01   :  { %v1079_v31 = vmul.f32 %v1077_v38, %v1077_v38 }
 0xd03   :  { %v1083_v34 = vsel %vm70_vm0, %v1079_v31, 0.0 }
 0xd04   :  { %1084 = vadd.xlane.f32.xlu0 %v1083_v34 }
 0xd14   :  { %v1235_v36 = vpop.permute.xlu1 %1234 }
 0xd15   :  { %2256 = vmatmul.msk.f32.vlgmr.msrb.gmra.mxu3 %vm177_vm5, %v1235_v36 }
 0xd1c   :  { %v1170_v37 = vpop.permute.xlu1 %1169 }
 0xd1d   :  { %2252 = vmatpush.xpose.msk.msra.mxu1 %vm177_vm5, %v1170_v37 }
 0xd20   :  { %2253 = vmatmul.msk.f32.vlgmr.msra.gmra.mxu1 %vm177_vm5, %v2912_v28 }
 0xd24   :  { %v1276_v41 = vpop.permute.xlu1 %1275 }
 0xd25   :  { %1296 = vmatpush.msrb.mxu2 %v1276_v41 }
 0xd2c   :  { %v1350_v42 = vpop.permute.xlu1 %1349 }
 0xd2d   :  { %2260 = vmatpush.xpose.msk.msra.mxu2 %vm177_vm5, %v1350_v42 }
 0xd34   :  { %v1348_v12 = vpop.permute.xlu1 %1347 }
 0xd3c   :  { %v1441_v16 = vpop.permute.xlu1 %1440 }
 0xd77   :  { %v1085_v43 = vpop.xlane.xlu0 %1084 }
 0xd78   :  { %v1087_v45 = vmul.f32 %v1085_v43, %v2563_v8 }
 0xd7a   :  { %v1089_v46 = vadd.f32 1e-05, %v1087_v45 }
 0xd7c   :  { %2396 = vrsqrt.f32 %v1089_v46  ;;  %vm1106_vm4 = vweird.f32 %v1089_v46 }
 0xd82   :  { %v2397_v47 = vpop.eup %2396 }
 0xd83   :  { %v1101_v49 = vmul.f32 %v2397_v47, %v1089_v46  ;;  %vm1107_vm3 = vweird.f32 %v2397_v47  ;;  %v2245_v46 = vld [vmem:[%s3226_s6 + $0x20] sm:$0xff] }
 0xd84   :  { %vm1108_vm6 = vmor %vm1106_vm4, %vm1107_vm3  ;;  %1342 = vmatpush.msra.mxu3 %v2245_v46 }
 0xd85   :  { %v1102_v50 = vmul.f32 %v2397_v47, %v1101_v49 }
 0xd87   :  { %v1103_v51 = vmul.f32 0.5, %v1102_v50 }
 0xd89   :  { %v1104_v33 = vsub.f32 1.5, %v1103_v51 }
 0xd8b   :  { %v1105_v52 = vmul.f32 %v2397_v47, %v1104_v33 }
 0xd8d   :  { %v1109_v53 = vsel %vm1108_vm6, %v2397_v47, %v1105_v52  ;;  %v2246_v52 = vld [vmem:[%s3226_s6 + $0x28] sm:$0xff] }
 0xd8e   :  { %v1111_v55 = vmul.f32 %v1109_v53, %v1077_v38 }
 0xd90   :  { %v1116_v56 = vmul.f32 %v2336_v6, %v1111_v55 }
 0xd92   :  { %v2937_v57 = vadd.f32 %v2337_v20, %v1116_v56 }
 0xd94   :  { %2251 = vmatmul.msk.f32.gmra.mxu0 %vm70_vm0, %v2937_v57 }
 0xd98   :  { %v1259_v59 = vpop.f32.mrf.mxu3 }
 0xd99   :  { %v1262_v60 = vmul.f32 0.35355338, %v1259_v59 }
 0xd9b   :  { %v1263_v63 = vadd.f32 %v1262_v60, %v2621_v40 }
 0xd9d   :  { %v1264_v0 = vsel %vm177_vm5, %v1263_v63, -inf  ;;  %v1192_v27 = vpop.f32.mrf.mxu1 }
 0xd9e   :  { %v1195_v48 = vmul.f32 0.35355338, %v1192_v27 }
 0xda0   :  { %v1196_v1 = vadd.f32 %v1195_v48, %v2621_v40 }
 0xda2   :  { %v1197_v2 = vsel %vm177_vm5, %v1196_v1, -inf }
 0xe11   :  { %v1165_v58 = vpop.f32.mrf.mxu0 }
 0xe12   :  { %v2941_v54 = vadd.f32 %v2338_v44, %v1165_v58 }
 0xe14   :  { %1531 = vrot.lane.b32.xlu0 %v2941_v54, %s2444_s28  ;;  %s3272_s28 = smov 40  }
 0xe3e   :  { %1265 = vmax.xlane.f32.xlu0 %v1264_v0 }
 0xe52   :  { %1438 = vrot.lane.b32.xlu0 %v2912_v28, %s3271_s23 }
 0xe7c   :  { %1198 = vmax.xlane.f32.xlu0 %v1197_v2 }
 0xe86   :  { %v1532_v39 = vpop.permute.xlu0 %1531 }
 0xe87   :  { %2268 = vmatpush.xpose.msk.msra.mxu0 %vm177_vm5, %v1532_v39 }
 0xe8a   :  { %2269 = vmatmul.msk.f32.vlgmr.msra.gmra.mxu0 %vm177_vm5, %v2941_v54 }
 0xe8b   :  { %1681 = vmatpush.msrb.mxu0 %v2246_v52 }
 0xe90   :  { %1479 = vrot.lane.b32.xlu0 %v2912_v28, %s3272_s28 }
 0xeb1   :  { %v1266_v3 = vpop.xlane.xlu0 %1265 }
 0xeb2   :  { %v1267_v4 = vsub.f32 %v1263_v63, %v1266_v3 }
 0xeb4   :  { %v1268_v5 = vmul.f32 1.442695, %v1267_v4 }
 0xeb6   :  { %2398 = vpow2.f32 %v1268_v5 }
 0xebc   :  { %v2399_v7 = vpop.eup %2398 }
 0xebd   :  { %v1270_v9 = vsel %vm177_vm5, %v2399_v7, 0.0 }
 0xebe   :  { %1271 = vadd.xlane.f32.xlu2 %v1270_v9 }
 0xec4   :  { %v1439_v6 = vpop.permute.xlu0 %1438 }
 0xeef   :  { %v1199_v44 = vpop.xlane.xlu0 %1198 }
 0xef0   :  { %v1200_v29 = vsub.f32 %v1196_v1, %v1199_v44 }
 0xef2   :  { %v1201_v38 = vmul.f32 1.442695, %v1200_v29 }
 0xf02   :  { %v1480_v1 = vpop.permute.xlu0 %1479 }
 0xf07   :  { %v1554_v35 = vpop.f32.mrf.mxu0 }
 0xf08   :  { %v1557_v10 = vmul.f32 0.35355338, %v1554_v35 }
 0xf0a   :  { %v1558_v32 = vadd.f32 %v1557_v10, %v2707_v62 }
 0xf0c   :  { %v1559_v11 = vsel %vm177_vm5, %v1558_v32, -inf }
 0xf0d   :  { %1560 = vmax.xlane.f32.xlu2 %v1559_v11 }
 0xf25   :  { %1570 = vrot.lane.b32.xlu2 %v2941_v54, %s3273_s3 }
 0xf31   :  { %v1272_v13 = vpop.xlane.xlu2 %1271 }
 0xf32   :  { %2400 = vrcp.f32 %v1272_v13 }
 0xf38   :  { %v2401_v14 = vpop.eup %2400 }
 0xf39   :  { %v1274_v15 = vmul.f32 %v2401_v14, %v2399_v7  ;;  %v2247_v14 = vld [vmem:[%s3226_s6 + $0x30] sm:$0xff] }
 0xf3a   :  { %1432 = vmatpush.msrb.mxu3 %v2247_v14  ;;  %1794 = vmatpush.msra.mxu0 %v2247_v14 }
 0xf3b   :  { %2257 = vmatmul.msk.f32.vlgmr.msrb.gmra.mxu2 %vm177_vm5, %v1274_v15  ;;  %v3017_v15 = vld [vmem:[%s3226_s6 + $0x38] sm:$0xff] }
 0xf3c   :  { %2264 = vmatpush.xpose.msk.msrb.mxu2 %vm177_vm5, %v1441_v16 }
 0xf43   :  { %2261 = vmatmul.msk.f32.vlgmr.msra.gmra.mxu2 %vm177_vm5, %v1348_v12 }
 0xf4b   :  { %2265 = vmatmul.msk.f32.vlgmr.msrb.gmra.mxu2 %vm177_vm5, %v1439_v6 }
 0xf80   :  { %v1561_v17 = vpop.xlane.xlu2 %1560 }
 0xf81   :  { %v1562_v18 = vsub.f32 %v1558_v32, %v1561_v17 }
 0xf83   :  { %v1563_v19 = vmul.f32 1.442695, %v1562_v18 }
 0xf85   :  { %2402 = vpow2.f32 %v1563_v19 }
 0xf86   :  { %2404 = vpow2.f32 %v1201_v38 }
 0xf88   :  { %v1571_v20 = vpop.permute.xlu2 %1570 }
 0xf89   :  { %1591 = vmatpush.msra.mxu2 %v1571_v20 }
 0xf8b   :  { %v2403_v21 = vpop.eup %2402  ;;  %1704 = vmatpush.msrb.mxu2 %v2245_v46 }
 0xf8c   :  { %v1565_v22 = vsel %vm177_vm5, %v2403_v21, 0.0  ;;  %v2405_v41 = vpop.eup %2404 }
 0xf8d   :  { %1566 = vadd.xlane.f32.xlu1 %v1565_v22  ;;  %v1203_v42 = vsel %vm177_vm5, %v2405_v41, 0.0 }
 0xfbe   :  { %v2966_v23 = vpop.f32.mrf.mxu2 }
 0xfc6   :  { %v1372_v25 = vpop.f32.mrf.mxu2 }
 0xfc7   :  { %v1375_v26 = vmul.f32 0.35355338, %v1372_v25 }
 0xfc9   :  { %v1376_v24 = vadd.f32 %v1375_v26, %v2621_v40 }
 0xfcb   :  { %v1377_v61 = vsel %vm177_vm5, %v1376_v24, -inf }
 0xfcc   :  { %1378 = vmax.xlane.f32.xlu2 %v1377_v61 }
 0xfce   :  { %v1463_v31 = vpop.f32.mrf.mxu2 }
 0xfcf   :  { %v1466_v34 = vmul.f32 0.35355338, %v1463_v31 }
 0xfd1   :  { %v1467_v36 = vadd.f32 %v1466_v34, %v2621_v40 }
 0xfd3   :  { %v1468_v37 = vsel %vm177_vm5, %v1467_v36, -inf }
 0xfd4   :  { %1469 = vmax.xlane.f32.xlu1 %v1468_v37 }
 0xfdc   :  { %1204 = vadd.xlane.f32.xlu1 %v1203_v42 }
 0xfe4   :  { %1388 = vrot.lane.b32.xlu2 %v2912_v28, %s3274_s29 }
 0xfec   :  { %1802 = vrot.lane.b32.xlu2 %v2941_v54, %s3270_s5 }
 0xff4   :  { %1709 = vrot.lane.b32.xlu2 %v2941_v54, %s3269_s26 }
 0xff5   :  { %1208 = vrot.lane.b32.xlu1 %v2912_v28, %s3273_s3 }
 0xffd   :  { %1598 = vrot.lane.b32.xlu1 %v2941_v54, %s2445_s4 }
0x1000   :  { %v1567_v40 = vpop.xlane.xlu1 %1566 }
0x1001   :  { %2406 = vrcp.f32 %v1567_v40 }
0x1005   :  { %1596 = vrot.lane.b32.xlu1 %v2941_v54, %s2443_s27 }
0x1007   :  { %v2407_v43 = vpop.eup %2406 }
0x1008   :  { %v1569_v45 = vmul.f32 %v2407_v43, %v2403_v21 }
0x100a   :  { %2270 = vmatmul.msk.f32.vlgmr.msra.gmra.mxu2 %vm177_vm5, %v1569_v45 }
0x100d   :  { %1711 = vrot.lane.b32.xlu1 %v2941_v54, %s3268_s2 }
0x103f   :  { %v1379_v28 = vpop.xlane.xlu2 %1378 }
0x1040   :  { %v1380_v47 = vsub.f32 %v1376_v24, %v1379_v28 }
0x1042   :  { %v1381_v49 = vmul.f32 1.442695, %v1380_v47 }
0x1044   :  { %2408 = vpow2.f32 %v1381_v49  ;;  %v3036_v49 = vld [vmem:[%s3227_s7 + $0x1] ss:$0 sm:$0xff] }
0x1047   :  { %v1389_v50 = vpop.permute.xlu2 %1388  ;;  %v1470_v51 = vpop.xlane.xlu1 %1469 }
0x1048   :  { %v1471_v33 = vsub.f32 %v1467_v36, %v1470_v51 }
0x104a   :  { %v2409_v53 = vpop.eup %2408  ;;  %v1472_v55 = vmul.f32 1.442695, %v1471_v33 }
0x104b   :  { %v1383_v56 = vsel %vm177_vm5, %v2409_v53, 0.0 }
0x104c   :  { %2410 = vpow2.f32 %v1472_v55  ;;  %1384 = vadd.xlane.f32.xlu0 %v1383_v56 }
0x104f   :  { %v1803_v58 = vpop.permute.xlu2 %1802  ;;  %v1205_v63 = vpop.xlane.xlu1 %1204 }
0x1050   :  { %2280 = vmatpush.xpose.msk.msra.mxu2 %vm177_vm5, %v1803_v58  ;;  %2412 = vrcp.f32 %v1205_v63 }
0x1052   :  { %v2411_v59 = vpop.eup %2410 }
0x1053   :  { %v1474_v60 = vsel %vm177_vm5, %v2411_v59, 0.0 }
0x1054   :  { %1475 = vadd.xlane.f32.xlu0 %v1474_v60 }
0x1056   :  { %v2413_v0 = vpop.eup %2412 }
0x1057   :  { %v1207_v27 = vmul.f32 %v2413_v0, %v2405_v41  ;;  %v1710_v12 = vpop.permute.xlu2 %1709 }
0x1067   :  { %v1209_v48 = vpop.permute.xlu1 %1208 }
0x1068   :  { %1800 = vrot.lane.b32.xlu0 %v2941_v54, %s3271_s23  ;;  %1229 = vmatpush.msrb.mxu1 %v1209_v48 }
0x1069   :  { %2254 = vmatmul.msk.f32.vlgmr.msrb.gmra.mxu1 %vm177_vm5, %v1207_v27 }
0x106a   :  { %1319 = vmatpush.msra.mxu1 %v2246_v52 }
0x106c   :  { %1409 = vmatpush.msrb.mxu1 %v1389_v50 }
0x106f   :  { %v1599_v39 = vpop.permute.xlu1 %1598 }
0x1071   :  { %2258 = vmatmul.msk.f32.vlgmr.msra.gmra.mxu1 %vm177_vm5, %v2966_v23 }
0x1072   :  { %1500 = vmatpush.msra.mxu1 %v1480_v1 }
0x1077   :  { %v1597_v5 = vpop.permute.xlu1 %1596 }
0x107f   :  { %v1712_v32 = vpop.permute.xlu1 %1711 }
0x108d   :  { %v1593_v2 = vpop.f32.mrf.mxu2 }
0x108e   :  { %2275 = vmatmul.msk.f32.vlgmr.msrb.gmra.mxu2 %vm177_vm5, %v1593_v2 }
0x10bf   :  { %v1385_v3 = vpop.xlane.xlu0 %1384 }
0x10c0   :  { %2414 = vrcp.f32 %v1385_v3 }
0x10c6   :  { %v2415_v4 = vpop.eup %2414 }
0x10c7   :  { %v1387_v7 = vmul.f32 %v2415_v4, %v2409_v53  ;;  %v1476_v9 = vpop.xlane.xlu0 %1475 }
0x10c8   :  { %2416 = vrcp.f32 %v1476_v9 }
0x10c9   :  { %2262 = vmatmul.msk.f32.vlgmr.msrb.gmra.mxu1 %vm177_vm5, %v1387_v7 }
0x10ca   :  { %2271 = vmatpush.xpose.msk.msrb.mxu1 %vm177_vm5, %v1599_v39 }
0x10ce   :  { %v2417_v35 = vpop.eup %2416 }
0x10cf   :  { %v1478_v10 = vmul.f32 %v2417_v35, %v2411_v59 }
0x10d1   :  { %2266 = vmatmul.msk.f32.vlgmr.msra.gmra.mxu1 %vm177_vm5, %v1478_v10 }
0x10d2   :  { %2276 = vmatpush.xpose.msk.msra.mxu1 %vm177_vm5, %v1712_v32 }
0x10d9   :  { %2272 = vmatmul.msk.f32.vlgmr.msrb.gmra.mxu1 %vm177_vm5, %v1597_v5 }
0x10da   :  { %v1801_v11 = vpop.permute.xlu0 %1800 }
0x10db   :  { %2281 = vmatmul.msk.f32.vlgmr.msra.gmra.mxu2 %vm177_vm5, %v1801_v11 }
0x10e1   :  { %2277 = vmatmul.msk.f32.vlgmr.msra.gmra.mxu1 %vm177_vm5, %v1710_v12 }
0x10e6   :  { %v1231_v13 = vpop.f32.mrf.mxu1 }
0x10e7   :  { %2259 = vmatmul.msk.f32.vlgmr.msra.gmra.mxu3 %vm177_vm5, %v1231_v13 }
0x10e8   :  { %1523 = vmatpush.msra.mxu3 %v3017_v15 }
0x10ee   :  { %v1321_v16 = vpop.f32.mrf.mxu1 }
0x1111   :  { %v3022_v18 = vpop.f32.mrf.mxu2 }
0x1146   :  { %v1411_v6 = vpop.f32.mrf.mxu1 }
0x1147   :  { %2263 = vmatmul.msk.f32.vlgmr.msrb.gmra.mxu3 %vm177_vm5, %v1411_v6 }
0x114e   :  { %v1502_v17 = vpop.f32.mrf.mxu1 }
0x114f   :  { %2267 = vmatmul.msk.f32.vlgmr.msra.gmra.mxu3 %vm177_vm5, %v1502_v17  ;;  %v2289_v17 = vld [vmem:[%s3231_s10 + $0x38] sm:$0xff] }
0x1156   :  { %v1621_v19 = vpop.f32.mrf.mxu1 }
0x1157   :  { %v1624_v20 = vmul.f32 0.35355338, %v1621_v19 }
0x1159   :  { %v1625_v21 = vadd.f32 %v1624_v20, %v2707_v62 }
0x115b   :  { %v1626_v22 = vsel %vm177_vm5, %v1625_v21, -inf }
0x115c   :  { %1627 = vmax.xlane.f32.xlu0 %v1626_v22 }
0x115e   :  { %v1734_v23 = vpop.f32.mrf.mxu1  ;;  %v1825_v25 = vpop.f32.mrf.mxu2 }
0x115f   :  { %v1737_v44 = vmul.f32 0.35355338, %v1734_v23  ;;  %v1828_v26 = vmul.f32 0.35355338, %v1825_v25  ;;  %v2286_v23 = vld [vmem:[%s3231_s10 + $0x20] sm:$0xff] }
0x1161   :  { %v1829_v24 = vadd.f32 %v1828_v26, %v2707_v62  ;;  %v1738_v29 = vadd.f32 %v1737_v44, %v2707_v62 }
0x1163   :  { %v1830_v61 = vsel %vm177_vm5, %v1829_v24, -inf  ;;  %v1739_v38 = vsel %vm177_vm5, %v1738_v29, -inf }
0x1164   :  { %1831 = vmax.xlane.f32.xlu2 %v1830_v61  ;;  %1740 = vmax.xlane.f32.xlu1 %v1739_v38  ;;  %v3072_v61 = vld [vmem:[%s3228_s8 + $0x1] ss:$0 sm:$0xff] }
0x116a   :  { %v1344_v31 = vpop.f32.mrf.mxu3 }
0x116b   :  { %v1345_v36 = vadd.f32 %v1344_v31, %v1321_v16 }
0x117c   :  { %1637 = vrot.lane.b32.xlu2 %v2941_v54, %s2446_s0 }
0x11ca   :  { %v1434_v34 = vpop.f32.mrf.mxu3 }
0x11cb   :  { %v1437_v42 = vadd.f32 %v1434_v34, %v1345_v36  ;;  %v3079_v36 = vld [vmem:[%s3229_s9 + $0x1] ss:$0 sm:$0xff] }
0x11cf   :  { %v1628_v37 = vpop.xlane.xlu0 %1627 }
0x11d0   :  { %v1629_v41 = vsub.f32 %v1625_v21, %v1628_v37  ;;  %v2288_v21 = vld [vmem:[%s3231_s10 + $0x30] sm:$0xff] }
0x11d2   :  { %v1630_v40 = vmul.f32 1.442695, %v1629_v41  ;;  %v1525_v43 = vpop.f32.mrf.mxu3  ;;  %v2308_v41 = vld [vmem:[%s3232_s12 + $0xf8] sm:$0xff] }
0x11d3   :  { %v1528_v45 = vadd.f32 %v1525_v43, %v1437_v42  ;;  %2038 = vmatpush.msrb.mxu2 %v2308_v41  ;;  %v2307_v42 = vld [vmem:[%s3232_s12 + $0xf0] sm:$0xff]  ;;  %v2305_v43 = vld [vmem:[%s3232_s12 + $0xe0] sm:$0xff] }
0x11d4   :  { %2418 = vpow2.f32 %v1630_v40  ;;  %v2306_v40 = vld [vmem:[%s3232_s12 + $0xe8] sm:$0xff] }
0x11d5   :  { %1529 = vst.msk [vmem:[#allocation2] sm:$0xff] %vm70_vm0, %v1528_v45  ;;  %2039 = vmatpush.msrb.mxu2 %v2307_v42  ;;  %v2304_v45 = vld [vmem:[%s3232_s12 + $0xd8] sm:$0xff] }
0x11d7   :  { %v1832_v62 = vpop.xlane.xlu2 %1831  ;;  %v1741_v46 = vpop.xlane.xlu1 %1740  ;;  %2040 = vmatpush.msrb.mxu2 %v2306_v40 }
0x11d8   :  { %v1833_v28 = vsub.f32 %v1829_v24, %v1832_v62  ;;  %v1742_v47 = vsub.f32 %v1738_v29, %v1741_v46  ;;  %v2303_v62 = vld [vmem:[%s3232_s12 + $0xd0] sm:$0xff]  ;;  %v2302_v46 = vld [vmem:[%s3232_s12 + $0xc8] sm:$0xff] }
0x11d9   :  { %2041 = vmatpush.msrb.mxu2 %v2305_v43 }
0x11da   :  { %v2419_v50 = vpop.eup %2418  ;;  %v1834_v51 = vmul.f32 1.442695, %v1833_v28  ;;  %v1743_v33 = vmul.f32 1.442695, %v1742_v47  ;;  %v2301_v28 = vld [vmem:[%s3232_s12 + $0xc0] sm:$0xff]  ;;  %v2300_v47 = vld [vmem:[%s3232_s12 + $0xb8] sm:$0xff] }
0x11db   :  { %v1632_v52 = vsel %vm177_vm5, %v2419_v50, 0.0  ;;  %2042 = vmatpush.msrb.mxu2 %v2304_v45 }
0x11dc   :  { %2420 = vpow2.f32 %v1834_v51  ;;  %1633 = vadd.xlane.f32.xlu0 %v1632_v52  ;;  %v1892_v53 = vld [vmem:[#allocation2] sm:$0xff]  ;;  %v2298_v51 = vld [vmem:[%s3232_s12 + $0xa8] sm:$0xff] }
0x11dd   :  { %2422 = vpow2.f32 %v1743_v33  ;;  %v1897_v55 = vadd.f32 %v3036_v49, %v1892_v53  ;;  %2043 = vmatpush.msrb.mxu2 %v2303_v62  ;;  %v2297_v33 = vld [vmem:[%s3232_s12 + $0xa0] sm:$0xff]  ;;  %v2296_v53 = vld [vmem:[%s3232_s12 + $0x98] sm:$0xff] }
0x11de   :  { %v2124_v62 = vld [vmem:[%s3237_s16 + $0x18] sm:$0xff] }
0x11df   :  { %v1638_v56 = vpop.permute.xlu2 %1637  ;;  %v1899_v58 = vadd.f32 %v1897_v55, %v2903_v30  ;;  %2044 = vmatpush.msrb.mxu2 %v2302_v46  ;;  %v2295_v55 = vld [vmem:[%s3232_s12 + $0x90] sm:$0xff]  ;;  %v2121_v46 = vld [vmem:[%s3237_s16] sm:$0xff] }
0x11e0   :  { %1658 = vmatpush.msrb.mxu3 %v1638_v56  ;;  %v2294_v56 = vld [vmem:[%s3232_s12 + $0x88] sm:$0xff] }
0x11e1   :  { %v1905_v59 = vsel %vm70_vm0, %v1899_v58, 0.0  ;;  %2045 = vmatpush.msrb.mxu2 %v2301_v28  ;;  %v2163_v28 = vld [vmem:[%s3238_s18 + $0x18] sm:$0xff] }
0x11e2   :  { %v2421_v60 = vpop.eup %2420  ;;  %1906 = vadd.xlane.f32.xlu2 %v1905_v59 }
0x11e3   :  { %v2423_v63 = vpop.eup %2422  ;;  %v1836_v0 = vsel %vm177_vm5, %v2421_v60, 0.0  ;;  %2046 = vmatpush.msrb.mxu2 %v2300_v47 }
0x11e4   :  { %1837 = vadd.xlane.f32.xlu0 %v1836_v0  ;;  %v1745_v27 = vsel %vm177_vm5, %v2423_v63, 0.0 }
0x11e5   :  { %1746 = vadd.xlane.f32.xlu1 %v1745_v27 }
0x11f8   :  { %1841 = vrot.lane.b32.xlu0 %v2941_v54, %s3272_s28 }
0x11fe   :  { %1750 = vrot.lane.b32.xlu1 %v2941_v54, %s3274_s29 }
0x124f   :  { %v1634_v48 = vpop.xlane.xlu0 %1633 }
0x1250   :  { %2424 = vrcp.f32 %v1634_v48  ;;  %v3139_v48 = vld [vmem:[%s3230_s11 + $0x1] ss:$0 sm:$0xff] }
0x1255   :  { %v1907_v30 = vpop.xlane.xlu2 %1906 }
0x1256   :  { %v2425_v1 = vpop.eup %2424  ;;  %v1911_v2 = vmul.f32 %v1907_v30, %v2563_v8 }
0x1257   :  { %v1636_v39 = vmul.f32 %v2425_v1, %v2419_v50  ;;  %v1838_v7 = vpop.xlane.xlu0 %1837  ;;  %v2299_v50 = vld [vmem:[%s3232_s12 + $0xb0] sm:$0xff] }
0x1258   :  { %v1913_v3 = vsub.f32 %v1899_v58, %v1911_v2  ;;  %2426 = vrcp.f32 %v1838_v7  ;;  %v1747_v9 = vpop.xlane.xlu1 %1746  ;;  %2047 = vmatpush.msrb.mxu2 %v2299_v50  ;;  %v2293_v58 = vld [vmem:[%s3232_s12 + $0x80] sm:$0xff] }
0x1259   :  { %2273 = vmatmul.msk.f32.vlgmr.msrb.gmra.mxu3 %vm177_vm5, %v1636_v39  ;;  %2428 = vrcp.f32 %v1747_v9 }
0x125a   :  { %v1915_v4 = vmul.f32 %v1913_v3, %v1913_v3  ;;  %2048 = vmatpush.msrb.mxu2 %v2298_v51 }
0x125c   :  { %v1917_v5 = vsel %vm70_vm0, %v1915_v4, 0.0  ;;  %2049 = vmatpush.msrb.mxu2 %v2297_v33 }
0x125d   :  { %1918 = vadd.xlane.f32.xlu0 %v1917_v5 }
0x125e   :  { %v2427_v35 = vpop.eup %2426  ;;  %2050 = vmatpush.msrb.mxu2 %v2296_v53 }
0x125f   :  { %v1840_v54 = vmul.f32 %v2427_v35, %v2421_v60  ;;  %v2429_v32 = vpop.eup %2428 }
0x1260   :  { %v1749_v11 = vmul.f32 %v2429_v32, %v2423_v63  ;;  %2051 = vmatpush.msrb.mxu2 %v2295_v55 }
0x1262   :  { %2052 = vmatpush.msrb.mxu2 %v2294_v56 }
0x1264   :  { %2053 = vmatpush.msrb.mxu2 %v2293_v58 }
0x126a   :  { %v1842_v10 = vpop.permute.xlu0 %1841 }
0x126b   :  { %1862 = vmatpush.msrb.mxu1 %v1842_v10 }
0x126c   :  { %2282 = vmatmul.msk.f32.vlgmr.msrb.gmra.mxu1 %vm177_vm5, %v1840_v54 }
0x126d   :  { %2147 = vmatpush.msra.mxu1 %v2124_v62 }
0x1270   :  { %v1751_v12 = vpop.permute.xlu1 %1750 }
0x1271   :  { %1771 = vmatpush.msra.mxu3 %v1751_v12 }
0x1272   :  { %2278 = vmatmul.msk.f32.vlgmr.msra.gmra.mxu3 %vm177_vm5, %v1749_v11 }
0x1273   :  { %1885 = vmatpush.msrb.mxu3 %v3017_v15  ;;  %v2287_v15 = vld [vmem:[%s3231_s10 + $0x28] sm:$0xff] }
0x1275   :  { %2186 = vmatpush.msra.mxu3 %v2163_v28 }
0x12d0   :  { %v1919_v13 = vpop.xlane.xlu0 %1918 }
0x12d1   :  { %v1923_v14 = vmul.f32 %v1919_v13, %v2563_v8 }
0x12d3   :  { %v1925_v16 = vadd.f32 1e-05, %v1923_v14 }
0x12d5   :  { %2430 = vrsqrt.f32 %v1925_v16  ;;  %vm1933_vm8 = vweird.f32 %v1925_v16 }
0x12db   :  { %v2431_v6 = vpop.eup %2430 }
0x12dc   :  { %v1660_v19 = vpop.f32.mrf.mxu3  ;;  %v1928_v20 = vmul.f32 %v2431_v6, %v1925_v16  ;;  %vm1934_vm7 = vweird.f32 %v2431_v6 }
0x12dd   :  { %2274 = vmatmul.msk.f32.vlgmr.msrb.gmra.mxu0 %vm177_vm5, %v1660_v19  ;;  %vm1935_vm9 = vmor %vm1933_vm8, %vm1934_vm7 }
0x12de   :  { %1987 = vmatpush.msrb.mxu0 %v2289_v17  ;;  %v1929_v22 = vmul.f32 %v2431_v6, %v1928_v20 }
0x12e0   :  { %1988 = vmatpush.msrb.mxu0 %v2288_v21  ;;  %v1930_v25 = vmul.f32 0.5, %v1929_v22 }
0x12e2   :  { %1989 = vmatpush.msrb.mxu0 %v2287_v15  ;;  %v1931_v44 = vsub.f32 1.5, %v1930_v25 }
0x12e4   :  { %1990 = vmatpush.msrb.mxu0 %v2286_v23  ;;  %v1932_v24 = vmul.f32 %v2431_v6, %v1931_v44 }
0x12e6   :  { %v1936_v29 = vsel %vm1935_vm9, %v2431_v6, %v1932_v24 }
0x12e7   :  { %v1947_v38 = vmul.f32 %v1936_v29, %v1913_v3 }
0x12e9   :  { %v1864_v26 = vpop.f32.mrf.mxu1  ;;  %v1952_v34 = vmul.f32 %v3072_v61, %v1947_v38 }
0x12ea   :  { %2283 = vmatmul.msk.f32.vlgmr.msrb.gmra.mxu3 %vm177_vm5, %v1864_v26 }
0x12eb   :  { %v3082_v37 = vadd.f32 %v3079_v36, %v1952_v34 }
0x12f5   :  { %v1773_v31 = vpop.f32.mrf.mxu3 }
0x12f6   :  { %2279 = vmatmul.msk.f32.vlgmr.msra.gmra.mxu0 %vm177_vm5, %v1773_v31 }
0x12fe   :  { %2291 = vmatmul.msk.f32.vlgmr.msrb.gmra.mxu0 %vm70_vm0, %v3082_v37 }
0x135a   :  { %v1683_v52 = vpop.f32.mrf.mxu0 }
0x135b   :  { %v1707_v59 = vadd.f32 %v3022_v18, %v1683_v52 }
0x136d   :  { %v1887_v0 = vpop.f32.mrf.mxu3 }
0x1373   :  { %v1796_v60 = vpop.f32.mrf.mxu0 }
0x1374   :  { %v1799_v63 = vadd.f32 %v1796_v60, %v1707_v59 }
0x1376   :  { %v1890_v27 = vadd.f32 %v1887_v0, %v1799_v63 }
0x1378   :  { %1891 = vst.msk [vmem:[#allocation2 + $0x8] sm:$0xff] %vm70_vm0, %v1890_v27 }
0x137b   :  { %v1992_v30 = vpop.f32.mrf.mxu0 }
0x137c   :  { %v1993_v1 = vadd.f32 %v3139_v48, %v1992_v30 }
0x137e   :  { %v1998_v2 = vmul.f32 %v1993_v1, %v1993_v1 }
0x137f   :  { %v1893_v39 = vld [vmem:[#allocation2 + $0x8] sm:$0xff] }
0x1380   :  { %v2000_v3 = vmul.f32 %v1998_v2, %v1993_v1  ;;  %v1898_v18 = vadd.f32 %v3036_v49, %v1893_v39 }
0x1382   :  { %v2002_v4 = vmul.f32 0.044715, %v2000_v3  ;;  %v1900_v5 = vadd.f32 %v1898_v18, %v2937_v57  ;;  %v3150_v57 = vld [vmem:[%s3233_s13 + $0x1] ss:$0 sm:$0xff] }
0x1384   :  { %v2004_v7 = vadd.f32 %v2002_v4, %v1993_v1  ;;  %v1908_v9 = vsel %vm70_vm0, %v1900_v5, 0.0 }
0x1385   :  { %1909 = vadd.xlane.f32.xlu1 %v1908_v9 }
0x1386   :  { %v2006_v35 = vmul.f32 0.7978846, %v2004_v7 }
0x1388   :  { %2432 = vtanh.f32 %v2006_v35 }
0x138e   :  { %v2433_v54 = vpop.eup %2432 }
0x138f   :  { %v2010_v10 = vadd.f32 1.0, %v2433_v54  ;;  %v2162_v54 = vld [vmem:[%s3238_s18 + $0x10] sm:$0xff] }
0x1390   :  { %2187 = vmatpush.msra.mxu3 %v2162_v54 }
0x1391   :  { %v2012_v32 = vmul.f32 0.5, %v2010_v10  ;;  %v2161_v10 = vld [vmem:[%s3238_s18 + $0x8] sm:$0xff] }
0x1392   :  { %2188 = vmatpush.msra.mxu3 %v2161_v10 }
0x1393   :  { %v2014_v11 = vmul.f32 %v2012_v32, %v1993_v1  ;;  %v2160_v32 = vld [vmem:[%s3238_s18] sm:$0xff] }
0x1394   :  { %2189 = vmatpush.msra.mxu3 %v2160_v32 }
0x1395   :  { %2054 = vmatmul.f32.vlgmr.msrb.gmra.mxu2 %v2014_v11  ;;  %v2346_v11 = vld [vmem:[%s3236_s17] ss:$0 sm:$0xff] }
0x13f8   :  { %v1910_v12 = vpop.xlane.xlu1 %1909 }
0x13f9   :  { %v1912_v13 = vmul.f32 %v1910_v12, %v2563_v8 }
0x13fb   :  { %v1914_v14 = vsub.f32 %v1900_v5, %v1912_v13  ;;  %v2345_v5 = vld [vmem:[%s3235_s15 + $0x1] ss:$0 sm:$0xff] }
0x13fd   :  { %v1916_v16 = vmul.f32 %v1914_v14, %v1914_v14 }
0x13ff   :  { %v1920_v49 = vsel %vm70_vm0, %v1916_v16, 0.0 }
0x1400   :  { %1921 = vadd.xlane.f32.xlu2 %v1920_v49 }
0x1418   :  { %v2055_v6 = vpop.f32.mrf.mxu2 }
0x1419   :  { %v2056_v17 = vadd.f32 %v3150_v57, %v2055_v6 }
0x141b   :  { %v2061_v19 = vadd.f32 %v2056_v17, %v3082_v37 }
0x141d   :  { %v2067_v20 = vsel %vm70_vm0, %v2061_v19, 0.0 }
0x141e   :  { %2068 = vadd.xlane.f32.xlu1 %v2067_v20 }
0x1473   :  { %v1922_v21 = vpop.xlane.xlu2 %1921 }
0x1474   :  { %v1924_v15 = vmul.f32 %v1922_v21, %v2563_v8 }
0x1476   :  { %v1926_v22 = vadd.f32 1e-05, %v1924_v15 }
0x1478   :  { %2434 = vrsqrt.f32 %v1926_v22  ;;  %vm1943_vm10 = vweird.f32 %v1926_v22 }
0x147e   :  { %v2435_v23 = vpop.eup %2434 }
0x147f   :  { %v1938_v25 = vmul.f32 %v2435_v23, %v1926_v22  ;;  %vm1944_vm5 = vweird.f32 %v2435_v23 }
0x1480   :  { %vm1945_vm11 = vmor %vm1943_vm10, %vm1944_vm5 }
0x1481   :  { %v1939_v44 = vmul.f32 %v2435_v23, %v1938_v25 }
0x1483   :  { %v1940_v26 = vmul.f32 0.5, %v1939_v44 }
0x1485   :  { %v1941_v24 = vsub.f32 1.5, %v1940_v26 }
0x1487   :  { %v1942_v29 = vmul.f32 %v2435_v23, %v1941_v24 }
0x1489   :  { %v1946_v38 = vsel %vm1945_vm11, %v2435_v23, %v1942_v29  ;;  %v2347_v23 = vld [vmem:[%s3239_s19] ss:$0 sm:$0xff] }
0x148a   :  { %v1948_v31 = vmul.f32 %v1946_v38, %v1914_v14 }
0x148c   :  { %v1953_v34 = vmul.f32 %v3072_v61, %v1948_v31  ;;  %v2123_v61 = vld [vmem:[%s3237_s16 + $0x10] sm:$0xff] }
0x148d   :  { %2148 = vmatpush.msra.mxu1 %v2123_v61 }
0x148e   :  { %v3158_v37 = vadd.f32 %v3079_v36, %v1953_v34  ;;  %v2122_v36 = vld [vmem:[%s3237_s16 + $0x8] sm:$0xff] }
0x148f   :  { %2149 = vmatpush.msra.mxu1 %v2122_v36 }
0x1490   :  { %2292 = vmatmul.msk.f32.gmra.mxu0 %vm70_vm0, %v3158_v37 }
0x1491   :  { %v2069_v41 = vpop.xlane.xlu1 %2068  ;;  %2150 = vmatpush.msra.mxu1 %v2121_v46 }
0x1492   :  { %v2073_v42 = vmul.f32 %v2069_v41, %v2563_v8 }
0x1494   :  { %v2075_v40 = vsub.f32 %v2061_v19, %v2073_v42 }
0x1496   :  { %v2077_v43 = vmul.f32 %v2075_v40, %v2075_v40 }
0x1498   :  { %v2079_v45 = vsel %vm70_vm0, %v2077_v43, 0.0 }
0x1499   :  { %2080 = vadd.xlane.f32.xlu2 %v2079_v45 }
0x150c   :  { %v2081_v47 = vpop.xlane.xlu2 %2080 }
0x150d   :  { %v2085_v50 = vmul.f32 %v2081_v47, %v2563_v8  ;;  %v1995_v51 = vpop.f32.mrf.mxu0 }
0x150e   :  { %v1996_v33 = vadd.f32 %v3139_v48, %v1995_v51  ;;  %v2344_v48 = vld [vmem:[%s3234_s14 + $0x1] ss:$0 sm:$0xff] }
0x150f   :  { %v2087_v52 = vadd.f32 1e-05, %v2085_v50 }
0x1510   :  { %v1999_v53 = vmul.f32 %v1996_v33, %v1996_v33 }
0x1511   :  { %2436 = vrsqrt.f32 %v2087_v52  ;;  %vm2095_vm13 = vweird.f32 %v2087_v52 }
0x1512   :  { %v2001_v55 = vmul.f32 %v1999_v53, %v1996_v33 }
0x1514   :  { %v2003_v56 = vmul.f32 0.044715, %v2001_v55 }
0x1516   :  { %v2005_v58 = vadd.f32 %v2003_v56, %v1996_v33 }
0x1517   :  { %v2437_v59 = vpop.eup %2436 }
0x1518   :  { %v2090_v60 = vmul.f32 %v2437_v59, %v2087_v52  ;;  %v2007_v63 = vmul.f32 0.7978846, %v2005_v58  ;;  %vm2096_vm12 = vweird.f32 %v2437_v59 }
0x1519   :  { %vm2097_vm14 = vmor %vm2095_vm13, %vm2096_vm12 }
0x151a   :  { %v2091_v0 = vmul.f32 %v2437_v59, %v2090_v60  ;;  %2438 = vtanh.f32 %v2007_v63 }
0x151c   :  { %v2092_v27 = vmul.f32 0.5, %v2091_v0 }
0x151e   :  { %v2093_v30 = vsub.f32 1.5, %v2092_v27 }
0x1520   :  { %v2439_v1 = vpop.eup %2438  ;;  %v2094_v2 = vmul.f32 %v2437_v59, %v2093_v30 }
0x1521   :  { %v2011_v39 = vadd.f32 1.0, %v2439_v1 }
0x1522   :  { %v2098_v3 = vsel %vm2097_vm14, %v2437_v59, %v2094_v2 }
0x1523   :  { %v2109_v18 = vmul.f32 %v2098_v3, %v2075_v40  ;;  %v2013_v4 = vmul.f32 0.5, %v2011_v39 }
0x1525   :  { %v2114_v7 = vmul.f32 %v2344_v48, %v2109_v18  ;;  %v2015_v9 = vmul.f32 %v2013_v4, %v1996_v33 }
0x1527   :  { %2057 = vmatmul.f32.gmra.mxu2 %v2015_v9  ;;  %v2119_v35 = vadd.f32 %v2345_v5, %v2114_v7 }
0x1529   :  { %2312 = vmatmul.msk.f32.vlgmr.msra.gmra.mxu1 %vm70_vm0, %v2119_v35 }
0x15a6   :  { %v2152_v12 = vpop.f32.mrf.mxu1 }
0x15a7   :  { %v2153_v13 = vadd.f32 %v2346_v11, %v2152_v12 }
0x15a9   :  { %v2158_v14 = vmax.f32 %v2153_v13, 0.0 }
0x15aa   :  { %v2058_v16 = vpop.f32.mrf.mxu2 }
0x15ab   :  { %v2059_v49 = vadd.f32 %v3150_v57, %v2058_v16  ;;  %2314 = vmatmul.msk.f32.vlgmr.msra.gmra.mxu3 %vm70_vm0, %v2158_v14 }
0x15ad   :  { %v2062_v6 = vadd.f32 %v2059_v49, %v3158_v37 }
0x15af   :  { %v2070_v17 = vsel %vm70_vm0, %v2062_v6, 0.0 }
0x15b0   :  { %2071 = vadd.xlane.f32.xlu0 %v2070_v17 }
0x1623   :  { %v2072_v19 = vpop.xlane.xlu0 %2071 }
0x1624   :  { %v2074_v20 = vmul.f32 %v2072_v19, %v2563_v8 }
0x1626   :  { %v2076_v21 = vsub.f32 %v2062_v6, %v2074_v20 }
0x1628   :  { %v2078_v15 = vmul.f32 %v2076_v21, %v2076_v21 }
0x162a   :  { %v2082_v22 = vsel %vm70_vm0, %v2078_v15, 0.0 }
0x162b   :  { %2083 = vadd.xlane.f32.xlu1 %v2082_v22 }
0x162e   :  { %v2191_v57 = vpop.f32.mrf.mxu3 }
0x162f   :  { %v2192_v25 = vadd.f32 %v2347_v23, %v2191_v57 }
0x1631   :  { %2198 = vst.msk [vmem:[%s3240_s20] sm:$0xff] %vm2197_vm15, %v2192_v25 }
0x169e   :  { %v2084_v44 = vpop.xlane.xlu1 %2083 }
0x169f   :  { %v2086_v26 = vmul.f32 %v2084_v44, %v2563_v8 }
0x16a1   :  { %v2088_v24 = vadd.f32 1e-05, %v2086_v26 }
0x16a3   :  { %2440 = vrsqrt.f32 %v2088_v24  ;;  %vm2105_vm2 = vweird.f32 %v2088_v24 }
0x16a9   :  { %v2441_v29 = vpop.eup %2440 }
0x16aa   :  { %v2100_v38 = vmul.f32 %v2441_v29, %v2088_v24  ;;  %vm2106_vm1 = vweird.f32 %v2441_v29 }
0x16ab   :  { %vm2107_vm3 = vmor %vm2105_vm2, %vm2106_vm1 }
0x16ac   :  { %v2101_v31 = vmul.f32 %v2441_v29, %v2100_v38 }
0x16ae   :  { %v2102_v34 = vmul.f32 0.5, %v2101_v31 }
0x16b0   :  { %v2103_v37 = vsub.f32 1.5, %v2102_v34 }
0x16b2   :  { %v2104_v41 = vmul.f32 %v2441_v29, %v2103_v37 }
0x16b4   :  { %v2108_v42 = vsel %vm2107_vm3, %v2441_v29, %v2104_v41 }
0x16b5   :  { %v2110_v40 = vmul.f32 %v2108_v42, %v2076_v21 }
0x16b7   :  { %v2115_v43 = vmul.f32 %v2344_v48, %v2110_v40 }
0x16b9   :  { %v2120_v45 = vadd.f32 %v2345_v5, %v2115_v43 }
0x16bb   :  { %2313 = vmatmul.msk.f32.gmra.mxu1 %vm70_vm0, %v2120_v45 }
0x1738   :  { %v2155_v62 = vpop.f32.mrf.mxu1 }
0x1739   :  { %v2156_v61 = vadd.f32 %v2346_v11, %v2155_v62 }
0x173b   :  { %v2159_v8 = vmax.f32 %v2156_v61, 0.0 }
0x173d   :  { %2315 = vmatmul.msk.f32.gmra.mxu3 %vm70_vm0, %v2159_v8 }
0x17c0   :  { %v2194_v36 = vpop.f32.mrf.mxu3 }
0x17c1   :  { %v2195_v46 = vadd.f32 %v2347_v23, %v2194_v36 }
0x17c3   :  { %2199 = vst.msk [vmem:[%s3240_s20 + $0x8] sm:$0xff] %vm2197_vm15, %v2195_v46 }

</bundles_post_ra>
